<compile_context>
chip_gen: v7x
topology: tpu7x:2x2x1
jax: 0.10.0
libtpu: 0.0.40
codegen_flags: <defaults>
</compile_context>

<pallas_src>
import jax
import jax.numpy as jnp
from jax import lax
from jax.experimental import pallas as pl
from jax.experimental.pallas import tpu as pltpu


# ----------------------------- Pallas kernel -------------------------------

def _silu_approx(x):
    # sigmoid via EUP exp + approx reciprocal (keeps VPU slots free).
    return x * pl.reciprocal(1.0 + jnp.exp(-x), approx=True)


def _silu_exact(x):
    # exact divide for the final epilogue (review accuracy note).
    return x * (1.0 / (1.0 + jnp.exp(-x)))


def _make_c2f_kernel(H, W, c, c2):
    Hp, Wp = H + 2, W + 2
    Np = Hp * Wp               # flattened padded spatial extent (lane dim)
    MARGIN = Wp + 1            # max |flat shift| of a 3x3 tap
    NW = Np + 2 * MARGIN       # wide staging-buffer width

    def kernel(x_ref, m_ref, wc1_ref, bc1_ref, wm_ref, bm_ref,
               wr_ref, br_ref, wfa_ref, wfb_ref, bo_ref, o_ref,
               xw_ref, col_ref, y_ref):
        m = m_ref[...]                                     # (1, Np) 0/1 f32

        # Zero only the margins of the wide staging buffer; the Np interior is
        # fully rewritten before every use.  Done every grid step (not gated
        # on program_id==0) so it is correct even when the "parallel" batch
        # axis is split across TensorCores.  Cost: 2 x (c, MARGIN) bf16 stores.
        xw_ref[:, :MARGIN] = jnp.zeros((c, MARGIN), jnp.bfloat16)
        xw_ref[:, MARGIN + Np:] = jnp.zeros((c, MARGIN), jnp.bfloat16)

        def conv3x3(w_flat_ref, b_ref):
            # im2col: 9 lane-shifted copies of the staged (c, Np) activation
            # -> col_ref (9c, Np); then ONE K=9c MXU matmul.
            for t in range(9):
                kh, kw = divmod(t, 3)
                s = (kh - 1) * Wp + (kw - 1)
                col_ref[t * c:(t + 1) * c, :] = \
                    xw_ref[:, MARGIN + s:MARGIN + s + Np]
            pre = jnp.dot(w_flat_ref[...], col_ref[...],
                          preferred_element_type=jnp.float32) + b_ref[...]
            return _silu_approx(pre)                       # (c, Np) f32

        # --- cv1: 1x1 conv + BN + SiLU (c1 -> 2c); mask re-zeroes pad pixels.
        y = jnp.dot(wc1_ref[...], x_ref[...],
                    preferred_element_type=jnp.float32) + bc1_ref[...]
        y = _silu_approx(y) * m                            # (2c, Np) f32
        y_ref[...] = y.astype(jnp.bfloat16)                # single cast; staged
        xw_ref[:, MARGIN:MARGIN + Np] = y_ref[c:, :]       # y1 -> conv staging

        # --- Bottleneck.cv1: 3x3 conv + BN + SiLU (c -> c); mask before reuse
        #     (it feeds the next spatial conv, so pad pixels must be zero).
        t_act = conv3x3(wm_ref, bm_ref) * m
        xw_ref[:, MARGIN:MARGIN + Np] = t_act.astype(jnp.bfloat16)

        # --- Bottleneck.cv2: re-parameterized RepVGG (3x3 + 1x1 + id BN) + SiLU.
        #     Pad-position values only feed discarded pad outputs -> no mask.
        y2 = conv3x3(wr_ref, br_ref)

        # --- cv2: 1x1 conv + BN + SiLU on concat([y0, y1, y2]) == [y | y2].
        acc = jnp.dot(wfa_ref[...], y_ref[...],
                      preferred_element_type=jnp.float32)
        acc = acc + jnp.dot(wfb_ref[...], y2.astype(jnp.bfloat16),
                            preferred_element_type=jnp.float32)
        o_ref[...] = _silu_exact(acc + bo_ref[...])

    return kernel, Np, NW


# --------------------------- weight preparation -----------------------------

def fold_conv_bn(p):
    """Fold eval-mode BN into conv: returns (w_folded OIHW, bias)."""
    scale = p['gamma'] / jnp.sqrt(p['var'] + p['eps'])
    w = p['w'] * scale[:, None, None, None]
    b = p['beta'] - p['mean'] * scale
    return w, b


def bn_scale_shift(p):
    s = p['gamma'] / jnp.sqrt(p['var'] + p['eps'])
    return s, p['beta'] - p['mean'] * s


def repvgg_reparam(p_dense, p_1x1, p_id):
    """RepVGG get_equivalent_kernel_bias: fold 1x1 + identity BN into the 3x3."""
    w3, b3 = fold_conv_bn(p_dense)                              # (c, c, 3, 3)
    w1, b1 = fold_conv_bn(p_1x1)                                # (c, c, 1, 1)
    s_id, t_id = bn_scale_shift(p_id)
    c = w3.shape[0]
    w1_as_3x3 = jnp.pad(w1, ((0, 0), (0, 0), (1, 1), (1, 1)))
    w_id = jnp.zeros((c, c, 3, 3), w3.dtype).at[
        jnp.arange(c), jnp.arange(c), 1, 1].set(s_id)
    return w3 + w1_as_3x3 + w_id, b3 + b1 + t_id


def conv3x3_w_to_flat(w_oihw):
    """OIHW (Cout,Cin,3,3) -> (Cout, 9*Cin); column index = (kh*3+kw)*Cin + ci."""
    cout, cin = w_oihw.shape[0], w_oihw.shape[1]
    return jnp.transpose(w_oihw, (0, 2, 3, 1)).reshape(cout, 9 * cin)


# ------------------------------ C2f forward --------------------------------

def c2f_pallas(x_nchw, P, c, c2):
    x = x_nchw.astype(jnp.float32)
    N, c1, H, W = x.shape
    Hp, Wp = H + 2, W + 2
    Np = Hp * Wp

    # BN folding + RepVGG re-parameterization (outside the kernel).
    w_cv1, b_cv1 = fold_conv_bn(P['cv1'])
    w_m1, b_m1 = fold_conv_bn(P['m0_cv1'])
    w_rep, b_rep = repvgg_reparam(P['m0_dense'], P['m0_1x1'], P['m0_id'])
    w_cv2, b_cv2 = fold_conv_bn(P['cv2'])

    # bf16 MXU operands (weights as matmul LHS), f32 (channel, 1) biases.
    wc1 = w_cv1[:, :, 0, 0].astype(jnp.bfloat16)                  # (2c, c1)
    wm = conv3x3_w_to_flat(w_m1).astype(jnp.bfloat16)             # (c, 9c)
    wr = conv3x3_w_to_flat(w_rep).astype(jnp.bfloat16)            # (c, 9c)
    wf = w_cv2[:, :, 0, 0]                                        # (c2, 3c)
    wfa = wf[:, :2 * c].astype(jnp.bfloat16)                      # (c2, 2c)
    wfb = wf[:, 2 * c:].astype(jnp.bfloat16)                      # (c2, c)
    bc1 = b_cv1.reshape(2 * c, 1).astype(jnp.float32)
    bm = b_m1.reshape(c, 1).astype(jnp.float32)
    br = b_rep.reshape(c, 1).astype(jnp.float32)
    bo = b_cv2.reshape(c2, 1).astype(jnp.float32)

    # Zero-padded, spatially flattened input (no transpose): (N, c1, Np) bf16.
    x_pad = jnp.pad(x, ((0, 0), (0, 0), (1, 1), (1, 1))).reshape(N, c1, Np)
    x_pad = x_pad.astype(jnp.bfloat16)
    # 0/1 interior mask over the flattened padded grid.
    mask = jnp.zeros((Hp, Wp), jnp.float32).at[1:H + 1, 1:W + 1].set(1.0)
    mask = mask.reshape(1, Np)

    kernel, _, NW = _make_c2f_kernel(H, W, c, c2)

    out = pl.pallas_call(
        kernel,
        out_shape=jax.ShapeDtypeStruct((N, c2, Np), jnp.float32),
        grid=(N,),
        in_specs=[
            pl.BlockSpec((None, c1, Np), lambda n: (n, 0, 0)),   # x (padded)
            pl.BlockSpec((1, Np), lambda n: (0, 0)),             # interior mask
            pl.BlockSpec((2 * c, c1), lambda n: (0, 0)),         # w cv1
            pl.BlockSpec((2 * c, 1), lambda n: (0, 0)),          # b cv1
            pl.BlockSpec((c, 9 * c), lambda n: (0, 0)),          # w m0.cv1
            pl.BlockSpec((c, 1), lambda n: (0, 0)),              # b m0.cv1
            pl.BlockSpec((c, 9 * c), lambda n: (0, 0)),          # w repvgg (fused)
            pl.BlockSpec((c, 1), lambda n: (0, 0)),              # b repvgg
            pl.BlockSpec((c2, 2 * c), lambda n: (0, 0)),         # w cv2[:, :2c]
            pl.BlockSpec((c2, c), lambda n: (0, 0)),             # w cv2[:, 2c:]
            pl.BlockSpec((c2, 1), lambda n: (0, 0)),             # b cv2
        ],
        out_specs=pl.BlockSpec((None, c2, Np), lambda n: (n, 0, 0)),
        scratch_shapes=[
            pltpu.VMEM((c, NW), jnp.bfloat16),        # wide conv staging buffer
            pltpu.VMEM((9 * c, Np), jnp.bfloat16),    # im2col tile
            pltpu.VMEM((2 * c, Np), jnp.bfloat16),    # staged cv1 output
        ],
        compiler_params=pltpu.CompilerParams(
            dimension_semantics=("parallel",)),
    )(x_pad, mask, wc1, bc1, wm, bm, wr, br, wfa, wfb, bo)

    # Un-pad: reshape + static slice only (no transpose).
    return out.reshape(N, c2, Hp, Wp)[:, :, 1:H + 1, 1:W + 1]


# ------------------------- pure-JAX reference (NCHW) -----------------------

def _conv2d_nchw(x, w, pad):
    return lax.conv_general_dilated(x, w, (1, 1), [(pad, pad), (pad, pad)],
                                    dimension_numbers=('NCHW', 'OIHW', 'NCHW'))


def _bn_eval(x, p):
    s = p['gamma'] / jnp.sqrt(p['var'] + p['eps'])
    return x * s[None, :, None, None] + (p['beta'] - p['mean'] * s)[None, :, None, None]


def _ref_conv(x, p, pad):
    return jax.nn.silu(_bn_eval(_conv2d_nchw(x, p['w'], pad), p))


def _ref_repvgg(x, pd, p1, pid):
    dense = _bn_eval(_conv2d_nchw(x, pd['w'], 1), pd)
    one = _bn_eval(_conv2d_nchw(x, p1['w'], 0), p1)
    idb = _bn_eval(x, pid)
    return jax.nn.silu(dense + one + idb)


def ref_c2f(x, P, c):
    y = _ref_conv(x, P['cv1'], 0)
    y0, y1 = y[:, :c], y[:, c:]
    t = _ref_conv(y1, P['m0_cv1'], 1)
    y2 = _ref_repvgg(t, P['m0_dense'], P['m0_1x1'], P['m0_id'])
    return _ref_conv(jnp.concatenate([y0, y1, y2], axis=1), P['cv2'], 0)


# ------------------------------- param init --------------------------------

def make_conv_bn(key, cout, cin, k):
    k1, k2, k3, k4, k5 = jax.random.split(key, 5)
    return dict(
        w=jax.random.normal(k1, (cout, cin, k, k), jnp.float32) * 0.2,
        gamma=jax.random.uniform(k2, (cout,), jnp.float32, 0.5, 1.5),
        beta=jax.random.normal(k3, (cout,), jnp.float32) * 0.1,
        mean=jax.random.normal(k4, (cout,), jnp.float32) * 0.1,
        var=jax.random.uniform(k5, (cout,), jnp.float32, 0.5, 1.5),
        eps=1e-5)


def make_bn(key, cch):
    k2, k3, k4, k5 = jax.random.split(key, 4)
    return dict(
        gamma=jax.random.uniform(k2, (cch,), jnp.float32, 0.5, 1.5),
        beta=jax.random.normal(k3, (cch,), jnp.float32) * 0.1,
        mean=jax.random.normal(k4, (cch,), jnp.float32) * 0.1,
        var=jax.random.uniform(k5, (cch,), jnp.float32, 0.5, 1.5),
        eps=1e-5)


if __name__ == "__main__":
    key = jax.random.PRNGKey(0)
    c1, c2, n = 4, 8, 1
    c = int(c2 * 0.5)                       # hidden channels = 4
    N, H, W = 2, 16, 16

    ks = jax.random.split(key, 8)
    P = {
        'cv1':      make_conv_bn(ks[0], 2 * c, c1, 1),
        'm0_cv1':   make_conv_bn(ks[1], c, c, 3),
        'm0_dense': make_conv_bn(ks[2], c, c, 3),
        'm0_1x1':   make_conv_bn(ks[3], c, c, 1),
        'm0_id':    make_bn(ks[4], c),
        'cv2':      make_conv_bn(ks[5], c2, (2 + n) * c, 1),
    }
    x = jax.random.normal(ks[6], (N, c1, H, W), jnp.float32)

    out = jax.block_until_ready(c2f_pallas(x, P, c, c2))
    assert out.shape == (N, c2, H, W)

    ref = jax.block_until_ready(ref_c2f(x, P, c))
    # Tolerance sized for intentional bf16 MXU operands across the conv chain.
    if not jnp.allclose(out, ref, atol=5e-2, rtol=5e-2):
        raise AssertionError(
            f"mismatch vs reference, max abs err={float(jnp.max(jnp.abs(out - ref)))}")

    print("KERNEL_OK")
</pallas_src>

<mosaic_0001>
module attributes {stable_mosaic.version = 11 : i64} {
  func.func @kernel(%arg0: i32, %arg1: memref<1x4x324xbf16, #tpu.memory_space<vmem>>, %arg2: memref<1x324xf32, #tpu.memory_space<vmem>>, %arg3: memref<8x4xbf16, #tpu.memory_space<vmem>>, %arg4: memref<8x1xf32, #tpu.memory_space<vmem>>, %arg5: memref<4x36xbf16, #tpu.memory_space<vmem>>, %arg6: memref<4x1xf32, #tpu.memory_space<vmem>>, %arg7: memref<4x36xbf16, #tpu.memory_space<vmem>>, %arg8: memref<4x1xf32, #tpu.memory_space<vmem>>, %arg9: memref<8x8xbf16, #tpu.memory_space<vmem>>, %arg10: memref<8x4xbf16, #tpu.memory_space<vmem>>, %arg11: memref<8x1xf32, #tpu.memory_space<vmem>>, %arg12: memref<1x8x324xf32, #tpu.memory_space<vmem>>, %arg13: memref<4x362xbf16, #tpu.memory_space<vmem>>, %arg14: memref<36x324xbf16, #tpu.memory_space<vmem>>, %arg15: memref<8x324xbf16, #tpu.memory_space<vmem>>) attributes {dimension_semantics = [#tpu.dimension_semantics<parallel>], iteration_bounds = array<i64: 2>, scalar_prefetch = 0 : i64, scratch_operands = 3 : i64, tpu.core_type = #tpu.core_type<tc>, window_params = [{transform_indices = @transform_0, window_bounds = array<i64: 1, 4, 324>}, {pipeline_mode = #tpu.pipeline_mode<synchronous>, transform_indices = @transform_1, window_bounds = array<i64: 1, 324>}, {pipeline_mode = #tpu.pipeline_mode<synchronous>, transform_indices = @transform_2, window_bounds = array<i64: 8, 4>}, {pipeline_mode = #tpu.pipeline_mode<synchronous>, transform_indices = @transform_3, window_bounds = array<i64: 8, 1>}, {pipeline_mode = #tpu.pipeline_mode<synchronous>, transform_indices = @transform_4, window_bounds = array<i64: 4, 36>}, {pipeline_mode = #tpu.pipeline_mode<synchronous>, transform_indices = @transform_5, window_bounds = array<i64: 4, 1>}, {pipeline_mode = #tpu.pipeline_mode<synchronous>, transform_indices = @transform_6, window_bounds = array<i64: 4, 36>}, {pipeline_mode = #tpu.pipeline_mode<synchronous>, transform_indices = @transform_7, window_bounds = array<i64: 4, 1>}, {pipeline_mode = #tpu.pipeline_mode<synchronous>, transform_indices = @transform_8, window_bounds = array<i64: 8, 8>}, {pipeline_mode = #tpu.pipeline_mode<synchronous>, transform_indices = @transform_9, window_bounds = array<i64: 8, 4>}, {pipeline_mode = #tpu.pipeline_mode<synchronous>, transform_indices = @transform_10, window_bounds = array<i64: 8, 1>}, {transform_indices = @transform_11, window_bounds = array<i64: 1, 8, 324>}]} {
    %c0 = arith.constant 0 : index
    %c0_0 = arith.constant 0 : index
    %0 = vector.load %arg2[%c0, %c0_0] : memref<1x324xf32, #tpu.memory_space<vmem>>, vector<1x324xf32>
    %cst = arith.constant 0.000000e+00 : bf16
    %1 = vector.broadcast %cst : bf16 to vector<4x19xbf16>
    %c0_1 = arith.constant 0 : index
    %c0_2 = arith.constant 0 : index
    %2 = vector.load %arg13[%c0_1, %c0_2] : memref<4x362xbf16, #tpu.memory_space<vmem>>, vector<4x19xbf16>
    tpu.vector_store %arg13[%c0_1, %c0_2], %1 {strides = array<i32>} : memref<4x362xbf16, #tpu.memory_space<vmem>>, vector<4x19xbf16>,
    %cst_3 = arith.constant 0.000000e+00 : bf16
    %3 = vector.broadcast %cst_3 : bf16 to vector<4x19xbf16>
    %c0_4 = arith.constant 0 : index
    %c343 = arith.constant 343 : index
    %4 = vector.load %arg13[%c0_4, %c343] : memref<4x362xbf16, #tpu.memory_space<vmem>>, vector<4x19xbf16>
    tpu.vector_store %arg13[%c0_4, %c343], %3 {strides = array<i32>} : memref<4x362xbf16, #tpu.memory_space<vmem>>, vector<4x19xbf16>,
    %c0_5 = arith.constant 0 : index
    %c0_6 = arith.constant 0 : index
    %5 = vector.load %arg3[%c0_5, %c0_6] : memref<8x4xbf16, #tpu.memory_space<vmem>>, vector<8x4xbf16>
    %c0_7 = arith.constant 0 : index
    %c0_8 = arith.constant 0 : index
    %c0_9 = arith.constant 0 : index
    %6 = vector.load %arg1[%c0_7, %c0_8, %c0_9] : memref<1x4x324xbf16, #tpu.memory_space<vmem>>, vector<1x4x324xbf16>
    %7 = vector.shape_cast %6 : vector<1x4x324xbf16> to vector<4x324xbf16>
    %cst_10 = arith.constant dense<0.000000e+00> : vector<8x324xf32>
    %8 = tpu.matmul %5, %7, %cst_10 {dimension_numbers = #tpu.dot_dimension_numbers<[1], [0], [0], [1], [0, 0, 1, 1], [], []>} : vector<8x4xbf16>, vector<4x324xbf16>, vector<8x324xf32> -> vector<8x324xf32>
    %c0_11 = arith.constant 0 : index
    %c0_12 = arith.constant 0 : index
    %9 = vector.load %arg4[%c0_11, %c0_12] : memref<8x1xf32, #tpu.memory_space<vmem>>, vector<8x1xf32>
    %10 = vector.broadcast %9 : vector<8x1xf32> to vector<8x324xf32>
    %11 = arith.addf %8, %10 : vector<8x324xf32>
    %cst_13 = arith.constant 0.000000e+00 : f32
    %12 = vector.broadcast %cst_13 : f32 to vector<8x324xf32>
    %13 = arith.subf %12, %11 : vector<8x324xf32>
    %14 = math.exp %13 : vector<8x324xf32>
    %cst_14 = arith.constant 1.000000e+00 : f32
    %15 = vector.broadcast %cst_14 : f32 to vector<8x324xf32>
    %16 = arith.addf %15, %14 : vector<8x324xf32>
    %17 = tpu.reciprocal %16 {approx = true} : vector<8x324xf32> -> vector<8x324xf32>
    %18 = arith.mulf %11, %17 : vector<8x324xf32>
    %19 = vector.broadcast %0 : vector<1x324xf32> to vector<8x324xf32>
    %20 = arith.mulf %18, %19 : vector<8x324xf32>
    %21 = arith.truncf %20 : vector<8x324xf32> to vector<8x324xbf16>
    %c0_15 = arith.constant 0 : index
    %c0_16 = arith.constant 0 : index
    %22 = vector.load %arg15[%c0_15, %c0_16] : memref<8x324xbf16, #tpu.memory_space<vmem>>, vector<8x324xbf16>
    tpu.vector_store %arg15[%c0_15, %c0_16], %21 {strides = array<i32>} : memref<8x324xbf16, #tpu.memory_space<vmem>>, vector<8x324xbf16>,
    %c4 = arith.constant 4 : index
    %c0_17 = arith.constant 0 : index
    %23 = vector.load %arg15[%c4, %c0_17] : memref<8x324xbf16, #tpu.memory_space<vmem>>, vector<4x324xbf16>
    %c0_18 = arith.constant 0 : index
    %c19 = arith.constant 19 : index
    %24 = vector.load %arg13[%c0_18, %c19] : memref<4x362xbf16, #tpu.memory_space<vmem>>, vector<4x324xbf16>
    tpu.vector_store %arg13[%c0_18, %c19], %23 {strides = array<i32>} : memref<4x362xbf16, #tpu.memory_space<vmem>>, vector<4x324xbf16>,
    %c0_19 = arith.constant 0 : index
    %c0_20 = arith.constant 0 : index
    %25 = vector.load %arg13[%c0_19, %c0_20] : memref<4x362xbf16, #tpu.memory_space<vmem>>, vector<4x324xbf16>
    %c0_21 = arith.constant 0 : index
    %c0_22 = arith.constant 0 : index
    %26 = vector.load %arg14[%c0_21, %c0_22] : memref<36x324xbf16, #tpu.memory_space<vmem>>, vector<4x324xbf16>
    tpu.vector_store %arg14[%c0_21, %c0_22], %25 {strides = array<i32>} : memref<36x324xbf16, #tpu.memory_space<vmem>>, vector<4x324xbf16>,
    %c0_23 = arith.constant 0 : index
    %c1 = arith.constant 1 : index
    %27 = vector.load %arg13[%c0_23, %c1] : memref<4x362xbf16, #tpu.memory_space<vmem>>, vector<4x324xbf16>
    %c4_24 = arith.constant 4 : index
    %c0_25 = arith.constant 0 : index
    %28 = vector.load %arg14[%c4_24, %c0_25] : memref<36x324xbf16, #tpu.memory_space<vmem>>, vector<4x324xbf16>
    tpu.vector_store %arg14[%c4_24, %c0_25], %27 {strides = array<i32>} : memref<36x324xbf16, #tpu.memory_space<vmem>>, vector<4x324xbf16>,
    %c0_26 = arith.constant 0 : index
    %c2 = arith.constant 2 : index
    %29 = vector.load %arg13[%c0_26, %c2] : memref<4x362xbf16, #tpu.memory_space<vmem>>, vector<4x324xbf16>
    %c8 = arith.constant 8 : index
    %c0_27 = arith.constant 0 : index
    %30 = vector.load %arg14[%c8, %c0_27] : memref<36x324xbf16, #tpu.memory_space<vmem>>, vector<4x324xbf16>
    tpu.vector_store %arg14[%c8, %c0_27], %29 {strides = array<i32>} : memref<36x324xbf16, #tpu.memory_space<vmem>>, vector<4x324xbf16>,
    %c0_28 = arith.constant 0 : index
    %c18 = arith.constant 18 : index
    %31 = vector.load %arg13[%c0_28, %c18] : memref<4x362xbf16, #tpu.memory_space<vmem>>, vector<4x324xbf16>
    %c12 = arith.constant 12 : index
    %c0_29 = arith.constant 0 : index
    %32 = vector.load %arg14[%c12, %c0_29] : memref<36x324xbf16, #tpu.memory_space<vmem>>, vector<4x324xbf16>
    tpu.vector_store %arg14[%c12, %c0_29], %31 {strides = array<i32>} : memref<36x324xbf16, #tpu.memory_space<vmem>>, vector<4x324xbf16>,
    %c0_30 = arith.constant 0 : index
    %c19_31 = arith.constant 19 : index
    %33 = vector.load %arg13[%c0_30, %c19_31] : memref<4x362xbf16, #tpu.memory_space<vmem>>, vector<4x324xbf16>
    %c16 = arith.constant 16 : index
    %c0_32 = arith.constant 0 : index
    %34 = vector.load %arg14[%c16, %c0_32] : memref<36x324xbf16, #tpu.memory_space<vmem>>, vector<4x324xbf16>
    tpu.vector_store %arg14[%c16, %c0_32], %33 {strides = array<i32>} : memref<36x324xbf16, #tpu.memory_space<vmem>>, vector<4x324xbf16>,
    %c0_33 = arith.constant 0 : index
    %c20 = arith.constant 20 : index
    %35 = vector.load %arg13[%c0_33, %c20] : memref<4x362xbf16, #tpu.memory_space<vmem>>, vector<4x324xbf16>
    %c20_34 = arith.constant 20 : index
    %c0_35 = arith.constant 0 : index
    %36 = vector.load %arg14[%c20_34, %c0_35] : memref<36x324xbf16, #tpu.memory_space<vmem>>, vector<4x324xbf16>
    tpu.vector_store %arg14[%c20_34, %c0_35], %35 {strides = array<i32>} : memref<36x324xbf16, #tpu.memory_space<vmem>>, vector<4x324xbf16>,
    %c0_36 = arith.constant 0 : index
    %c36 = arith.constant 36 : index
    %37 = vector.load %arg13[%c0_36, %c36] : memref<4x362xbf16, #tpu.memory_space<vmem>>, vector<4x324xbf16>
    %c24 = arith.constant 24 : index
    %c0_37 = arith.constant 0 : index
    %38 = vector.load %arg14[%c24, %c0_37] : memref<36x324xbf16, #tpu.memory_space<vmem>>, vector<4x324xbf16>
    tpu.vector_store %arg14[%c24, %c0_37], %37 {strides = array<i32>} : memref<36x324xbf16, #tpu.memory_space<vmem>>, vector<4x324xbf16>,
    %c0_38 = arith.constant 0 : index
    %c37 = arith.constant 37 : index
    %39 = vector.load %arg13[%c0_38, %c37] : memref<4x362xbf16, #tpu.memory_space<vmem>>, vector<4x324xbf16>
    %c28 = arith.constant 28 : index
    %c0_39 = arith.constant 0 : index
    %40 = vector.load %arg14[%c28, %c0_39] : memref<36x324xbf16, #tpu.memory_space<vmem>>, vector<4x324xbf16>
    tpu.vector_store %arg14[%c28, %c0_39], %39 {strides = array<i32>} : memref<36x324xbf16, #tpu.memory_space<vmem>>, vector<4x324xbf16>,
    %c0_40 = arith.constant 0 : index
    %c38 = arith.constant 38 : index
    %41 = vector.load %arg13[%c0_40, %c38] : memref<4x362xbf16, #tpu.memory_space<vmem>>, vector<4x324xbf16>
    %c32 = arith.constant 32 : index
    %c0_41 = arith.constant 0 : index
    %42 = vector.load %arg14[%c32, %c0_41] : memref<36x324xbf16, #tpu.memory_space<vmem>>, vector<4x324xbf16>
    tpu.vector_store %arg14[%c32, %c0_41], %41 {strides = array<i32>} : memref<36x324xbf16, #tpu.memory_space<vmem>>, vector<4x324xbf16>,
    %c0_42 = arith.constant 0 : index
    %c0_43 = arith.constant 0 : index
    %43 = vector.load %arg5[%c0_42, %c0_43] : memref<4x36xbf16, #tpu.memory_space<vmem>>, vector<4x36xbf16>
    %c0_44 = arith.constant 0 : index
    %c0_45 = arith.constant 0 : index
    %44 = vector.load %arg14[%c0_44, %c0_45] : memref<36x324xbf16, #tpu.memory_space<vmem>>, vector<36x324xbf16>
    %cst_46 = arith.constant dense<0.000000e+00> : vector<4x324xf32>
    %45 = tpu.matmul %43, %44, %cst_46 {dimension_numbers = #tpu.dot_dimension_numbers<[1], [0], [0], [1], [0, 0, 1, 1], [], []>} : vector<4x36xbf16>, vector<36x324xbf16>, vector<4x324xf32> -> vector<4x324xf32>
    %c0_47 = arith.constant 0 : index
    %c0_48 = arith.constant 0 : index
    %46 = vector.load %arg6[%c0_47, %c0_48] : memref<4x1xf32, #tpu.memory_space<vmem>>, vector<4x1xf32>
    %47 = vector.broadcast %46 : vector<4x1xf32> to vector<4x324xf32>
    %48 = arith.addf %45, %47 : vector<4x324xf32>
    %cst_49 = arith.constant 0.000000e+00 : f32
    %49 = vector.broadcast %cst_49 : f32 to vector<4x324xf32>
    %50 = arith.subf %49, %48 : vector<4x324xf32>
    %51 = math.exp %50 : vector<4x324xf32>
    %cst_50 = arith.constant 1.000000e+00 : f32
    %52 = vector.broadcast %cst_50 : f32 to vector<4x324xf32>
    %53 = arith.addf %52, %51 : vector<4x324xf32>
    %54 = tpu.reciprocal %53 {approx = true} : vector<4x324xf32> -> vector<4x324xf32>
    %55 = arith.mulf %48, %54 : vector<4x324xf32>
    %56 = vector.broadcast %0 : vector<1x324xf32> to vector<4x324xf32>
    %57 = arith.mulf %55, %56 : vector<4x324xf32>
    %58 = arith.truncf %57 : vector<4x324xf32> to vector<4x324xbf16>
    %c0_51 = arith.constant 0 : index
    %c19_52 = arith.constant 19 : index
    %59 = vector.load %arg13[%c0_51, %c19_52] : memref<4x362xbf16, #tpu.memory_space<vmem>>, vector<4x324xbf16>
    tpu.vector_store %arg13[%c0_51, %c19_52], %58 {strides = array<i32>} : memref<4x362xbf16, #tpu.memory_space<vmem>>, vector<4x324xbf16>,
    %c0_53 = arith.constant 0 : index
    %c0_54 = arith.constant 0 : index
    %60 = vector.load %arg13[%c0_53, %c0_54] : memref<4x362xbf16, #tpu.memory_space<vmem>>, vector<4x324xbf16>
    %c0_55 = arith.constant 0 : index
    %c0_56 = arith.constant 0 : index
    %61 = vector.load %arg14[%c0_55, %c0_56] : memref<36x324xbf16, #tpu.memory_space<vmem>>, vector<4x324xbf16>
    tpu.vector_store %arg14[%c0_55, %c0_56], %60 {strides = array<i32>} : memref<36x324xbf16, #tpu.memory_space<vmem>>, vector<4x324xbf16>,
    %c0_57 = arith.constant 0 : index
    %c1_58 = arith.constant 1 : index
    %62 = vector.load %arg13[%c0_57, %c1_58] : memref<4x362xbf16, #tpu.memory_space<vmem>>, vector<4x324xbf16>
    %c4_59 = arith.constant 4 : index
    %c0_60 = arith.constant 0 : index
    %63 = vector.load %arg14[%c4_59, %c0_60] : memref<36x324xbf16, #tpu.memory_space<vmem>>, vector<4x324xbf16>
    tpu.vector_store %arg14[%c4_59, %c0_60], %62 {strides = array<i32>} : memref<36x324xbf16, #tpu.memory_space<vmem>>, vector<4x324xbf16>,
    %c0_61 = arith.constant 0 : index
    %c2_62 = arith.constant 2 : index
    %64 = vector.load %arg13[%c0_61, %c2_62] : memref<4x362xbf16, #tpu.memory_space<vmem>>, vector<4x324xbf16>
    %c8_63 = arith.constant 8 : index
    %c0_64 = arith.constant 0 : index
    %65 = vector.load %arg14[%c8_63, %c0_64] : memref<36x324xbf16, #tpu.memory_space<vmem>>, vector<4x324xbf16>
    tpu.vector_store %arg14[%c8_63, %c0_64], %64 {strides = array<i32>} : memref<36x324xbf16, #tpu.memory_space<vmem>>, vector<4x324xbf16>,
    %c0_65 = arith.constant 0 : index
    %c18_66 = arith.constant 18 : index
    %66 = vector.load %arg13[%c0_65, %c18_66] : memref<4x362xbf16, #tpu.memory_space<vmem>>, vector<4x324xbf16>
    %c12_67 = arith.constant 12 : index
    %c0_68 = arith.constant 0 : index
    %67 = vector.load %arg14[%c12_67, %c0_68] : memref<36x324xbf16, #tpu.memory_space<vmem>>, vector<4x324xbf16>
    tpu.vector_store %arg14[%c12_67, %c0_68], %66 {strides = array<i32>} : memref<36x324xbf16, #tpu.memory_space<vmem>>, vector<4x324xbf16>,
    %c0_69 = arith.constant 0 : index
    %c19_70 = arith.constant 19 : index
    %68 = vector.load %arg13[%c0_69, %c19_70] : memref<4x362xbf16, #tpu.memory_space<vmem>>, vector<4x324xbf16>
    %c16_71 = arith.constant 16 : index
    %c0_72 = arith.constant 0 : index
    %69 = vector.load %arg14[%c16_71, %c0_72] : memref<36x324xbf16, #tpu.memory_space<vmem>>, vector<4x324xbf16>
    tpu.vector_store %arg14[%c16_71, %c0_72], %68 {strides = array<i32>} : memref<36x324xbf16, #tpu.memory_space<vmem>>, vector<4x324xbf16>,
    %c0_73 = arith.constant 0 : index
    %c20_74 = arith.constant 20 : index
    %70 = vector.load %arg13[%c0_73, %c20_74] : memref<4x362xbf16, #tpu.memory_space<vmem>>, vector<4x324xbf16>
    %c20_75 = arith.constant 20 : index
    %c0_76 = arith.constant 0 : index
    %71 = vector.load %arg14[%c20_75, %c0_76] : memref<36x324xbf16, #tpu.memory_space<vmem>>, vector<4x324xbf16>
    tpu.vector_store %arg14[%c20_75, %c0_76], %70 {strides = array<i32>} : memref<36x324xbf16, #tpu.memory_space<vmem>>, vector<4x324xbf16>,
    %c0_77 = arith.constant 0 : index
    %c36_78 = arith.constant 36 : index
    %72 = vector.load %arg13[%c0_77, %c36_78] : memref<4x362xbf16, #tpu.memory_space<vmem>>, vector<4x324xbf16>
    %c24_79 = arith.constant 24 : index
    %c0_80 = arith.constant 0 : index
    %73 = vector.load %arg14[%c24_79, %c0_80] : memref<36x324xbf16, #tpu.memory_space<vmem>>, vector<4x324xbf16>
    tpu.vector_store %arg14[%c24_79, %c0_80], %72 {strides = array<i32>} : memref<36x324xbf16, #tpu.memory_space<vmem>>, vector<4x324xbf16>,
    %c0_81 = arith.constant 0 : index
    %c37_82 = arith.constant 37 : index
    %74 = vector.load %arg13[%c0_81, %c37_82] : memref<4x362xbf16, #tpu.memory_space<vmem>>, vector<4x324xbf16>
    %c28_83 = arith.constant 28 : index
    %c0_84 = arith.constant 0 : index
    %75 = vector.load %arg14[%c28_83, %c0_84] : memref<36x324xbf16, #tpu.memory_space<vmem>>, vector<4x324xbf16>
    tpu.vector_store %arg14[%c28_83, %c0_84], %74 {strides = array<i32>} : memref<36x324xbf16, #tpu.memory_space<vmem>>, vector<4x324xbf16>,
    %c0_85 = arith.constant 0 : index
    %c38_86 = arith.constant 38 : index
    %76 = vector.load %arg13[%c0_85, %c38_86] : memref<4x362xbf16, #tpu.memory_space<vmem>>, vector<4x324xbf16>
    %c32_87 = arith.constant 32 : index
    %c0_88 = arith.constant 0 : index
    %77 = vector.load %arg14[%c32_87, %c0_88] : memref<36x324xbf16, #tpu.memory_space<vmem>>, vector<4x324xbf16>
    tpu.vector_store %arg14[%c32_87, %c0_88], %76 {strides = array<i32>} : memref<36x324xbf16, #tpu.memory_space<vmem>>, vector<4x324xbf16>,
    %c0_89 = arith.constant 0 : index
    %c0_90 = arith.constant 0 : index
    %78 = vector.load %arg7[%c0_89, %c0_90] : memref<4x36xbf16, #tpu.memory_space<vmem>>, vector<4x36xbf16>
    %c0_91 = arith.constant 0 : index
    %c0_92 = arith.constant 0 : index
    %79 = vector.load %arg14[%c0_91, %c0_92] : memref<36x324xbf16, #tpu.memory_space<vmem>>, vector<36x324xbf16>
    %cst_93 = arith.constant dense<0.000000e+00> : vector<4x324xf32>
    %80 = tpu.matmul %78, %79, %cst_93 {dimension_numbers = #tpu.dot_dimension_numbers<[1], [0], [0], [1], [0, 0, 1, 1], [], []>} : vector<4x36xbf16>, vector<36x324xbf16>, vector<4x324xf32> -> vector<4x324xf32>
    %c0_94 = arith.constant 0 : index
    %c0_95 = arith.constant 0 : index
    %81 = vector.load %arg8[%c0_94, %c0_95] : memref<4x1xf32, #tpu.memory_space<vmem>>, vector<4x1xf32>
    %82 = vector.broadcast %81 : vector<4x1xf32> to vector<4x324xf32>
    %83 = arith.addf %80, %82 : vector<4x324xf32>
    %cst_96 = arith.constant 0.000000e+00 : f32
    %84 = vector.broadcast %cst_96 : f32 to vector<4x324xf32>
    %85 = arith.subf %84, %83 : vector<4x324xf32>
    %86 = math.exp %85 : vector<4x324xf32>
    %cst_97 = arith.constant 1.000000e+00 : f32
    %87 = vector.broadcast %cst_97 : f32 to vector<4x324xf32>
    %88 = arith.addf %87, %86 : vector<4x324xf32>
    %89 = tpu.reciprocal %88 {approx = true} : vector<4x324xf32> -> vector<4x324xf32>
    %90 = arith.mulf %83, %89 : vector<4x324xf32>
    %c0_98 = arith.constant 0 : index
    %c0_99 = arith.constant 0 : index
    %91 = vector.load %arg9[%c0_98, %c0_99] : memref<8x8xbf16, #tpu.memory_space<vmem>>, vector<8x8xbf16>
    %c0_100 = arith.constant 0 : index
    %c0_101 = arith.constant 0 : index
    %92 = vector.load %arg15[%c0_100, %c0_101] : memref<8x324xbf16, #tpu.memory_space<vmem>>, vector<8x324xbf16>
    %cst_102 = arith.constant dense<0.000000e+00> : vector<8x324xf32>
    %93 = tpu.matmul %91, %92, %cst_102 {dimension_numbers = #tpu.dot_dimension_numbers<[1], [0], [0], [1], [0, 0, 1, 1], [], []>} : vector<8x8xbf16>, vector<8x324xbf16>, vector<8x324xf32> -> vector<8x324xf32>
    %c0_103 = arith.constant 0 : index
    %c0_104 = arith.constant 0 : index
    %94 = vector.load %arg10[%c0_103, %c0_104] : memref<8x4xbf16, #tpu.memory_space<vmem>>, vector<8x4xbf16>
    %95 = arith.truncf %90 : vector<4x324xf32> to vector<4x324xbf16>
    %cst_105 = arith.constant dense<0.000000e+00> : vector<8x324xf32>
    %96 = tpu.matmul %94, %95, %cst_105 {dimension_numbers = #tpu.dot_dimension_numbers<[1], [0], [0], [1], [0, 0, 1, 1], [], []>} : vector<8x4xbf16>, vector<4x324xbf16>, vector<8x324xf32> -> vector<8x324xf32>
    %97 = arith.addf %93, %96 : vector<8x324xf32>
    %c0_106 = arith.constant 0 : index
    %c0_107 = arith.constant 0 : index
    %98 = vector.load %arg11[%c0_106, %c0_107] : memref<8x1xf32, #tpu.memory_space<vmem>>, vector<8x1xf32>
    %99 = vector.broadcast %98 : vector<8x1xf32> to vector<8x324xf32>
    %100 = arith.addf %97, %99 : vector<8x324xf32>
    %cst_108 = arith.constant 0.000000e+00 : f32
    %101 = vector.broadcast %cst_108 : f32 to vector<8x324xf32>
    %102 = arith.subf %101, %100 : vector<8x324xf32>
    %103 = math.exp %102 : vector<8x324xf32>
    %cst_109 = arith.constant 1.000000e+00 : f32
    %104 = vector.broadcast %cst_109 : f32 to vector<8x324xf32>
    %105 = arith.addf %104, %103 : vector<8x324xf32>
    %cst_110 = arith.constant 1.000000e+00 : f32
    %106 = vector.broadcast %cst_110 : f32 to vector<8x324xf32>
    %107 = arith.divf %106, %105 : vector<8x324xf32>
    %108 = arith.mulf %100, %107 : vector<8x324xf32>
    %c0_111 = arith.constant 0 : index
    %c0_112 = arith.constant 0 : index
    %c0_113 = arith.constant 0 : index
    %109 = vector.load %arg12[%c0_111, %c0_112, %c0_113] : memref<1x8x324xf32, #tpu.memory_space<vmem>>, vector<1x8x324xf32>
    %110 = vector.shape_cast %109 : vector<1x8x324xf32> to vector<8x324xf32>
    %111 = vector.shape_cast %108 : vector<8x324xf32> to vector<1x8x324xf32>
    tpu.vector_store %arg12[%c0_111, %c0_112, %c0_113], %111 {strides = array<i32>} : memref<1x8x324xf32, #tpu.memory_space<vmem>>, vector<1x8x324xf32>,
    return
  }
  func.func @transform_0(%arg0: i32) -> (i32, i32, i32) {
    %c0_i32 = arith.constant 0 : i32
    %c0_i32_0 = arith.constant 0 : i32
    %c0_i32_1 = arith.constant 0 : i32
    return %arg0, %c0_i32, %c0_i32_0 : i32, i32, i32
  }
  func.func @transform_1(%arg0: i32) -> (i32, i32) {
    %c0_i32 = arith.constant 0 : i32
    %c0_i32_0 = arith.constant 0 : i32
    %c0_i32_1 = arith.constant 0 : i32
    return %c0_i32, %c0_i32_0 : i32, i32
  }
  func.func @transform_2(%arg0: i32) -> (i32, i32) {
    %c0_i32 = arith.constant 0 : i32
    %c0_i32_0 = arith.constant 0 : i32
    %c0_i32_1 = arith.constant 0 : i32
    return %c0_i32, %c0_i32_0 : i32, i32
  }
  func.func @transform_3(%arg0: i32) -> (i32, i32) {
    %c0_i32 = arith.constant 0 : i32
    %c0_i32_0 = arith.constant 0 : i32
    %c0_i32_1 = arith.constant 0 : i32
    return %c0_i32, %c0_i32_0 : i32, i32
  }
  func.func @transform_4(%arg0: i32) -> (i32, i32) {
    %c0_i32 = arith.constant 0 : i32
    %c0_i32_0 = arith.constant 0 : i32
    %c0_i32_1 = arith.constant 0 : i32
    return %c0_i32, %c0_i32_0 : i32, i32
  }
  func.func @transform_5(%arg0: i32) -> (i32, i32) {
    %c0_i32 = arith.constant 0 : i32
    %c0_i32_0 = arith.constant 0 : i32
    %c0_i32_1 = arith.constant 0 : i32
    return %c0_i32, %c0_i32_0 : i32, i32
  }
  func.func @transform_6(%arg0: i32) -> (i32, i32) {
    %c0_i32 = arith.constant 0 : i32
    %c0_i32_0 = arith.constant 0 : i32
    %c0_i32_1 = arith.constant 0 : i32
    return %c0_i32, %c0_i32_0 : i32, i32
  }
  func.func @transform_7(%arg0: i32) -> (i32, i32) {
    %c0_i32 = arith.constant 0 : i32
    %c0_i32_0 = arith.constant 0 : i32
    %c0_i32_1 = arith.constant 0 : i32
    return %c0_i32, %c0_i32_0 : i32, i32
  }
  func.func @transform_8(%arg0: i32) -> (i32, i32) {
    %c0_i32 = arith.constant 0 : i32
    %c0_i32_0 = arith.constant 0 : i32
    %c0_i32_1 = arith.constant 0 : i32
    return %c0_i32, %c0_i32_0 : i32, i32
  }
  func.func @transform_9(%arg0: i32) -> (i32, i32) {
    %c0_i32 = arith.constant 0 : i32
    %c0_i32_0 = arith.constant 0 : i32
    %c0_i32_1 = arith.constant 0 : i32
    return %c0_i32, %c0_i32_0 : i32, i32
  }
  func.func @transform_10(%arg0: i32) -> (i32, i32) {
    %c0_i32 = arith.constant 0 : i32
    %c0_i32_0 = arith.constant 0 : i32
    %c0_i32_1 = arith.constant 0 : i32
    return %c0_i32, %c0_i32_0 : i32, i32
  }
  func.func @transform_11(%arg0: i32) -> (i32, i32, i32) {
    %c0_i32 = arith.constant 0 : i32
    %c0_i32_0 = arith.constant 0 : i32
    %c0_i32_1 = arith.constant 0 : i32
    return %arg0, %c0_i32, %c0_i32_0 : i32, i32, i32
  }
}

</mosaic_0001>

<bundles_post_ra>
// kernel: tpu_custom_call.1
= control target key start
LH: loop header
LB: loop body
LE: loop exit
PB: predicated region body
PF: predicated region fallthrough
CT: control target
= control target key end

     0   :  { %s2526_s0 = inlined_call_operand.vmem [shape: bf16[2,4,324], index: 0, kind: input, shape index: {}]   ;;  %s2527_s1 = inlined_call_operand.vmem [shape: f32[1,324], index: 1, kind: input, shape index: {}]   ;;  %s2528_s2 = inlined_call_operand.vmem [shape: bf16[8,4], index: 2, kind: input, shape index: {}]   ;;  %s2529_s3 = inlined_call_operand.vmem [shape: f32[8,1], index: 3, kind: input, shape index: {}]   ;;  %s2530_s4 = inlined_call_operand.vmem [shape: bf16[4,36], index: 4, kind: input, shape index: {}]   ;;  %s2531_s5 = inlined_call_operand.vmem [shape: f32[4,1], index: 5, kind: input, shape index: {}]   ;;  %s2532_s6 = inlined_call_operand.vmem [shape: bf16[4,36], index: 6, kind: input, shape index: {}]   ;;  %s2533_s7 = inlined_call_operand.vmem [shape: f32[4,1], index: 7, kind: input, shape index: {}]   ;;  %s2534_s8 = inlined_call_operand.vmem [shape: bf16[8,8], index: 8, kind: input, shape index: {}]   ;;  %s2535_s9 = inlined_call_operand.vmem [shape: bf16[8,4], index: 9, kind: input, shape index: {}]   ;;  %s2536_s10 = inlined_call_operand.vmem [shape: f32[8,1], index: 10, kind: input, shape index: {}]   ;;  %s2537_s11 = inlined_call_operand.hbm [shape: f32[2,8,324], index: 11, kind: output, shape index: {}]  }
   0x1   :  { %2541 = sst [smem:[#allocation8_spill]] %s2526_s0 }
   0x2   :  { %16 = vsyncpa [#allocation6], 0 }
   0x3   :  { %18 = vsyncpa [#allocation6 + $0x1], 0  ;;  %s2183_s17 = smov 0   ;;  %s2185_s18 = smov 0  }
   0x4   :  { %s2187_s19 = smov 0   ;;  %s2189_s20 = smov 0  }
   0x5 LB: > { %s2204_s21 = sadd.s32 4294967295, %s2107_s20   ;;  %s1791_s22 = sadd.s32 4294967294, %s2107_s20   ;;  %s2107_s20 = sphi %s2189_s20, %s2553_s20   ;;  %s2103_s19 = sphi %s2187_s19, %s2552_s19   ;;  %s2099_s18 = sphi %s2185_s18, %s2551_s18   ;;  %s2095_s17 = sphi %s2183_s17, %s2550_s17  }
   0x6   : > { %s2208_s23 = sadd.s32 1, %s2107_s20   ;;  %s267_s24 = sadd.s32 1, %s2103_s19 }
   0x7   : > { %s264_s25 = ssub.s32 %s2107_s20, %s2208_s23  ;;  %p277_p0 = scmp.ne.s32.totalorder %s2103_s19, %s2099_s18 }
   0x8   : > { %p265_p1 = scmp.eq.s32.totalorder %s264_s25, 0  ;;  %p278_p2 = scmp.eq.s32.totalorder %s2204_s21, 1 }
   0x9   : > { %p283_p3 = scmp.ne.s32.totalorder %s2099_s18, %s2095_s17  ;;  %p284_p4 = scmp.eq.s32.totalorder %s1791_s22, 1 }
   0xa   : > { %s2219_s26 = scalar_select %p265_p1, %s2103_s19, %s267_s24  }
   0xb   : > { %p2221_p5 = por %p278_p2, %p277_p0  ;;  %p2225_p6 = por %p284_p4, %p283_p3 }
   0xc   : > { %p1794_p7 = scmp.ge.s32.totalorder %s2107_s20, 1  ;;  %p340_p8 = scmp.lt.s32.totalorder %s2107_s20, 3 }
   0xe   : > { %p341_p9 = pnand %p1794_p7, %p340_p8 }
   0xf   : > { %p380_p10 = scmp.lt.s32.totalorder (!%p341_p9), %s2204_s21, 1  ;;  %v404_v0 = vlaneseq (!%p341_p9)  ;;  %v2109_v1 = vmov (!%p341_p9), 1983009808   ;;  %v2110_v3 = vmov (!%p341_p9), 0.0   ;;  %v393_v4 = vld [vmem:[%s2529_s3] sm:$0xff] (!%p341_p9)  ;;  %v2111_v6 = vmov (!%p341_p9), 0  }
  0x10   : > { %344 = sbr.rel (%p341_p9) target bundleno = 1655 (0x677), region = 64  ;;  %v402_v2 = vunpack.c.l.s4 (!%p341_p9), %v2109_v1  ;;  %1858 = vmatprep.subr.bf16.mxu1 (!%p341_p9), %v2110_v3  ;;  %462 = vmatprep.mubr.bf16.mxu0 (!%p341_p9), %v2111_v6  ;;  %vm2112_vm0 = vmmov (!%p341_p9), 0   ;;  %s2544_s0 = sld [smem:[#allocation8_spill]] (!%p341_p9)  ;;  %vm420_vm1 = vcmask (!%p341_p9), 1041408   ;;  %v391_v16 = vld [vmem:[%s2528_s2] sm:$0xf] (!%p341_p9) }
  0x11   : > { %v2237_v5 = vshrl.u32 (!%p341_p9), %v404_v0, 7  ;;  %1860 = vmatprep.mubr.msk.bf16.mxu1 (!%p341_p9), %vm2112_vm0, %v2110_v3  ;;  %1951 = vset.pattern.permute.xlu0 (!%p341_p9), %v2111_v6  ;;  %vm2540_vm2 = vcmask (!%p341_p9), 31744   ;;  %vm387_vm3 = vcmask (!%p341_p9), 148480   ;;  %vm389_vm4 = vcmask (!%p341_p9), 861880   ;;  %v386_v42 = vld [vmem:[%s2527_s1] sm:$0x7] (!%p341_p9) }
  0x12   : > { %v403_v7 = vunpack.c.0.s8 (!%p341_p9), %v402_v2  ;;  %1952 = vset.pattern.permute.xlu1 (!%p341_p9), %v2111_v6  ;;  %396 = vperm.xlu0 (!%p341_p9), %1951, %v393_v4   ;;  %388 = vst.msk [vmem:[#allocation2] sm:$0x3] (!%p341_p9), %vm387_vm3, %v2111_v6  ;;  %vm562_vm5 = vcmask (!%p341_p9), 551936   ;;  %s2113_s30 = smov (!%p341_p9), 19   ;;  %vm589_vm6 = vcmask (!%p341_p9), 1041560   ;;  %vm590_vm7 = vcmask (!%p341_p9), 1043458  }
  0x13   : > { %390 = vst.msk [vmem:[#allocation2 + $0x4] sm:$0x3] (!%p341_p9), %vm389_vm4, %v2111_v6  ;;  %v532_v41 = vsub.s32 (!%p341_p9), 0, %v2237_v5  ;;  %v540_v43 = vsub.s32 (!%p341_p9), 2, %v2237_v5  ;;  %v536_v44 = vsub.s32 (!%p341_p9), 1, %v2237_v5  ;;  %vm591_vm8 = vmor (!%p341_p9), %vm590_vm7, %vm589_vm6  ;;  %vm592_vm9 = vcmask (!%p341_p9), 709636  }
  0x14   : > { %v2245_v8 = vsub.s32 (!%p341_p9), %v403_v7, %v2237_v5  ;;  %vm586_vm10 = vcmask (!%p341_p9), 154624   ;;  %vm2288_vm11 = vmor (!%p341_p9), %vm592_vm9, %vm591_vm8  ;;  %vm615_vm12 = vcmask (!%p341_p9), 549888   ;;  %s2116_s14 = smov (!%p341_p9), 109   ;;  %s2117_s15 = smov (!%p341_p9), 110   ;;  %vm647_vm13 = vcmask (!%p341_p9), 551938  }
  0x15   : > { %v2272_v45 = vrot.slane (!%p341_p9), %v386_v42, %v532_v41  ;;  %v2274_v47 = vrot.slane (!%p341_p9), %v386_v42, %v540_v43  ;;  %v2276_v50 = vrot.slane (!%p341_p9), %v386_v42, %v536_v44  ;;  %s2538_s22 = smov (!%p341_p9), 108   ;;  %s2120_s24 = smov (!%p341_p9), 91   ;;  %vm703_vm14 = vcmask (!%p341_p9), 900096  }
  0x16   : > { %s2121_s25 = smov (!%p341_p9), 90   ;;  %vm640_vm15 = vcmask (!%p341_p9), 1043456   ;;  %vm763_vm3 = vcmask (!%p341_p9), 883712   ;;  %vm642_vm4 = vcmask (!%p341_p9), 1039360   ;;  %vm673_vm6 = vcmask (!%p341_p9), 1031168  }
  0x17   : > { %s381_s12 = scalar_select %p380_p10, %s2204_s21, 1  ;;  %vm733_vm7 = vcmask 891904   ;;  %vm793_vm8 = vcmask 752640   ;;  %vm853_vm9 = vcmask 736256  }
  0x19   : > { %s1897_s13 = smul.u32 6, %s381_s12  ;;  %s2114_s12 = smov 126  }
  0x1b   : > { %s384_s16 = scalar_lea.vmem %s2544_s0, %s1897_s13  ;;  %s2115_s13 = smov 127  }
  0x1c   : > { %v392_v9 = vld [vmem:[%s384_s16] sm:$0x3f]  ;;  %s2118_s16 = smov 92  }
  0x1d   : > { %v407_v10 = vrot.slane %v392_v9, %v2245_v8  ;;  %v400_v11 = vcombine.high %v392_v9, %v392_v9 }
  0x1f   : > { %v415_v12 = vcombine.high %v407_v10, %v407_v10  ;;  %v422_v13 = vsel %vm420_vm1, %v407_v10, 0  ;;  %v414_v14 = vrot.slane %v400_v11, %v2245_v8 }
  0x21   : > { %1796 = vmatprep.subr.msk.bf16.mxu0 %vm420_vm1, %v415_v12  ;;  %v428_v15 = vsel %vm420_vm1, %v414_v14, 0 }
  0x22   : > { %431 = vmatpush1.bf16.msra.mxu0 %v422_v13  ;;  %1859 = vmatpush3.bf16.msra.mxu1 %v428_v15 }
  0x23   : > { %1864 = vmatprep.subr.bf16.mxu1 %v2110_v3 }
  0x25   : > { %1797 = vmatmul.mubr.msk.bf16.vlgmr.msra.gmra.mrb[0].mxu0 %vm2540_vm2, %v391_v16  ;;  %1861 = vmatmul.mubr.msk.bf16.vlgmr.msra.gmra.mrb[0].mxu1 %vm2540_vm2, %v391_v16  ;;  %vm916_vm2 = vcmask 293888  }
  0x26   : > { %1870 = vmatprep.mubr.msk.bf16.mxu1 %vm2112_vm0, %v2110_v3  ;;  %961 = vmatprep.mubr.bf16.mxu0 %v2111_v6 }
  0x91   : > { %v397_v17 = vpop.permute.xlu0 %396 }
  0xf8   : > { %v464_v18 = vpop.f32.mrb[0].mxu0  ;;  %v505_v19 = vpop.f32.mrb[0].mxu1 }
  0xf9   : > { %v465_v20 = vadd.f32 %v464_v18, %v397_v17  ;;  %v506_v21 = vadd.f32 %v505_v19, %v397_v17  ;;  %v466_v22 = vpop.f32.mrb[1].mxu0  ;;  %v1862_v23 = vpop.f32.mrb[1].mxu1 }
  0xfa   : > { %v467_v24 = vadd.f32 %v466_v22, %v397_v17  ;;  %v468_v25 = vpop.f32.mrb[2].mxu0  ;;  %v508_v26 = vpop.f32.mrb[2].mxu1 }
  0xfb   : > { %v511_v27 = vsub.f32 0.0, %v465_v20  ;;  %v513_v28 = vsub.f32 0.0, %v506_v21  ;;  %v469_v29 = vpop.f32.mrb[3].mxu0  ;;  %v1863_v30 = vpop.f32.mrb[3].mxu1 }
  0xfc   : > { %v512_v31 = vsub.f32 0.0, %v467_v24 }
  0xfd   : > { %v514_v32 = vmul.f32 1.442695, %v511_v27  ;;  %v518_v33 = vmul.f32 1.442695, %v513_v28 }
  0xfe   : > { %v516_v34 = vmul.f32 1.442695, %v512_v31 }
  0xff   : > { %1995 = vpow2.f32 %v514_v32 }
 0x100   : > { %1997 = vpow2.f32 %v518_v33 }
 0x101   : > { %1999 = vpow2.f32 %v516_v34 }
 0x109   : > { %v1996_v35 = vpop.eup %1995 }
 0x10a   : > { %v1998_v36 = vpop.eup %1997  ;;  %v520_v37 = vadd.f32 1.0, %v1996_v35 }
 0x10b   : > { %v2000_v38 = vpop.eup %1999  ;;  %v522_v39 = vadd.f32 1.0, %v1998_v36 }
 0x10c   : > { %2001 = vrcp.f32 %v520_v37  ;;  %v521_v40 = vadd.f32 1.0, %v2000_v38  ;;  %v870_v37 = vld [vmem:[%s2531_s5] sm:$0xf] }
 0x10d   : > { %2003 = vrcp.f32 %v522_v39 }
 0x10e   : > { %2005 = vrcp.f32 %v521_v40 }
 0x116   : > { %v2002_v46 = vpop.eup %2001 }
 0x117   : > { %v2004_v48 = vpop.eup %2003  ;;  %v526_v49 = vmul.f32 %v2002_v46, %v465_v20 }
 0x118   : > { %v2006_v51 = vpop.eup %2005  ;;  %v528_v52 = vmul.f32 %v2004_v48, %v506_v21 }
 0x119   : > { %v2279_v53 = vmul.f32 %v2272_v45, %v526_v49  ;;  %v527_v54 = vmul.f32 %v2006_v51, %v467_v24 }
 0x11a   : > { %v547_v55 = vmul.f32 %v2274_v47, %v528_v52 }
 0x11b   : > { %v2283_v56 = vmul.f32 %v2276_v50, %v527_v54 }
 0x11c   : > { %v1843_v57 = vpack.c.bf16 %v547_v55, %v547_v55 }
 0x11d   : > { %v1842_v58 = vpack.c.bf16 %v2283_v56, %v2279_v53 }
 0x11e   : > { %563 = vst.msk [vmem:[#allocation4 + $0x8] sm:$0xf] %vm562_vm5, %v1843_v57  ;;  %vm823_vm5 = vcmask 744448  }
 0x11f   : > { %561 = vst [vmem:[#allocation4] sm:$0xff] %v1842_v58 }
 0x125   : > { %v1802_v59 = vld.sshfl [vmem:[#allocation4 + $0x8] sm:$0x30 pattern:$0x76325410] }
 0x126   : > { %v1801_v60 = vld.sshfl [vmem:[#allocation4] sm:$0xf0 pattern:$0x76325410] }
 0x127   : > { %v582_v61 = vcombine.high %v1801_v60, %v1802_v59 }
 0x129   : > { %583 = vrot.lane.b32.xlu0 %v582_v61, %s2113_s30 }
 0x19b   : > { %v584_v62 = vpop.permute.xlu0 %583 }
 0x19c   : > { %v585_v0 = vrot.slane %v584_v62, 6 }
 0x19e   : > { %v587_v1 = vsel %vm586_vm10, %v585_v0, %v584_v62 }
 0x19f   : > { %594 = vst.msk [vmem:[#allocation2] sm:$0x3f] %vm2288_vm11, %v587_v1 }
 0x1a6   : > { %v595_v2 = vld [vmem:[#allocation2] sm:$0x3f] }
 0x1a7   : > { %v649_v4 = vld [vmem:[#allocation2] sm:$0x3f]  ;;  %v597_v7 = vcombine.high %v595_v2, %v595_v2  ;;  %1803 = vst.sshfl [vmem:[#allocation3] sm:$0xf pattern:$0x76325410] %v595_v2 }
 0x1a8   : > { %v617_v5 = vld [vmem:[#allocation2] sm:$0x3f]  ;;  %v658_v9 = vrot.slane %v649_v4, %v2245_v8  ;;  %v651_v29 = vcombine.high %v649_v4, %v649_v4 }
 0x1a9   : > { %v633_v10 = vrot.slane %v617_v5, %v2245_v8  ;;  %v709_v11 = vld [vmem:[#allocation2] sm:$0x3f]  ;;  %v611_v13 = vrot.slane %v597_v7, %v2245_v8  ;;  %v619_v25 = vcombine.low %v617_v5, %v617_v5 }
 0x1aa   : > { %v679_v12 = vld [vmem:[#allocation2] sm:$0x3f]  ;;  %666 = vrot.lane.b32.xlu0 %v658_v9, %s2114_s12  ;;  %v718_v14 = vrot.slane %v709_v11, %v2245_v8  ;;  %v665_v31 = vrot.slane %v651_v29, %v2245_v8  ;;  %v711_v32 = vcombine.high %v709_v11, %v709_v11 }
 0x1ab   : > { %636 = vrot.lane.b32.xlu1 %v633_v10, %s2115_s13  ;;  %v695_v15 = vrot.slane %v679_v12, %v2245_v8  ;;  %616 = vst.msk [vmem:[#allocation3 + $0x8] sm:$0x3] %vm615_vm12, %v611_v13  ;;  %v769_v16 = vld [vmem:[#allocation2] sm:$0x3f]  ;;  %v681_v20 = vcombine.low %v679_v12, %v679_v12  ;;  %v626_v27 = vrot.slane %v619_v25, %v2245_v8 }
 0x1ac   : > { %v739_v17 = vld [vmem:[#allocation2] sm:$0x3f]  ;;  %v778_v18 = vrot.slane %v769_v16, %v2245_v8  ;;  %v725_v35 = vrot.slane %v711_v32, %v2245_v8  ;;  %v771_v36 = vcombine.high %v769_v16, %v769_v16 }
 0x1ad   : > { %v755_v19 = vrot.slane %v739_v17, %v2245_v8  ;;  %v799_v21 = vld [vmem:[#allocation2] sm:$0x3f]  ;;  %v688_v22 = vrot.slane %v681_v20, %v2245_v8  ;;  %v741_v24 = vcombine.low %v739_v17, %v739_v17 }
 0x1ae   : > { %726 = vrot.lane.b32.xlu0 %v718_v14, %s2116_s14  ;;  %v815_v23 = vrot.slane %v799_v21, %v2245_v8  ;;  %v801_v28 = vcombine.low %v799_v21, %v799_v21  ;;  %v829_v33 = vld [vmem:[#allocation2] sm:$0x3f]  ;;  %v785_v38 = vrot.slane %v771_v36, %v2245_v8 }
 0x1af   : > { %698 = vrot.lane.b32.xlu1 %v695_v15, %s2117_s15  ;;  %v748_v26 = vrot.slane %v741_v24, %v2245_v8  ;;  %v838_v34 = vrot.slane %v829_v33, %v2245_v8  ;;  %v831_v39 = vcombine.high %v829_v33, %v829_v33 }
 0x1b0   : > { %v808_v30 = vrot.slane %v801_v28, %v2245_v8 }
 0x1b1   : > { %v845_v40 = vrot.slane %v831_v39, %v2245_v8 }
 0x1b2   : > { %786 = vrot.lane.b32.xlu0 %v778_v18, %s2118_s16 }
 0x1b3   : > { %758 = vrot.lane.b32.xlu1 %v755_v19, %s2538_s22 }
 0x1b6   : > { %696 = vrot.lane.b32.xlu0 %v688_v22, %s2117_s15 }
 0x1b7   : > { %818 = vrot.lane.b32.xlu1 %v815_v23, %s2120_s24 }
 0x1ba   : > { %756 = vrot.lane.b32.xlu0 %v748_v26, %s2538_s22 }
 0x1bb   : > { %634 = vrot.lane.b32.xlu1 %v626_v27, %s2115_s13 }
 0x1be   : > { %816 = vrot.lane.b32.xlu0 %v808_v30, %s2120_s24 }
 0x1bf   : > { %668 = vrot.lane.b32.xlu1 %v665_v31, %s2114_s12 }
 0x1c2   : > { %846 = vrot.lane.b32.xlu0 %v838_v34, %s2121_s25 }
 0x1c3   : > { %728 = vrot.lane.b32.xlu1 %v725_v35, %s2116_s14 }
 0x1c6   : > { %873 = vperm.xlu0 %1951, %v870_v37  }
 0x1c7   : > { %788 = vrot.lane.b32.xlu1 %v785_v38, %s2118_s16 }
 0x1cb   : > { %848 = vrot.lane.b32.xlu1 %v845_v40, %s2121_s25 }
 0x21c   : > { %v667_v41 = vpop.permute.xlu0 %666 }
 0x21d   : > { %v637_v42 = vpop.permute.xlu1 %636  ;;  %v670_v10 = vrot.slane %v667_v41, 4 }
 0x21e   : > { %648 = vst.msk [vmem:[#allocation3 + $0x8] sm:$0xc] %vm647_vm13, %v637_v42  ;;  %v639_v60 = vrot.slane %v637_v42, 4 }
 0x220   : > { %v727_v43 = vpop.permute.xlu0 %726 }
 0x221   : > { %v699_v44 = vpop.permute.xlu1 %698  ;;  %v730_v19 = vrot.slane %v727_v43, 4 }
 0x222   : > { %708 = vst.msk [vmem:[#allocation3 + $0x14] sm:$0xc] %vm647_vm13, %v699_v44  ;;  %v701_v52 = vrot.slane %v699_v44, 4 }
 0x224   : > { %v787_v46 = vpop.permute.xlu0 %786 }
 0x225   : > { %v759_v48 = vpop.permute.xlu1 %758  ;;  %v790_v25 = vrot.slane %v787_v46, 4 }
 0x226   : > { %768 = vst.msk [vmem:[#allocation3 + $0x20] sm:$0xc] %vm647_vm13, %v759_v48  ;;  %v761_v61 = vrot.slane %v759_v48, 4 }
 0x228   : > { %v697_v49 = vpop.permute.xlu0 %696 }
 0x229   : > { %v819_v51 = vpop.permute.xlu1 %818  ;;  %v700_v54 = vrot.slane %v697_v49, 4 }
 0x22a   : > { %828 = vst.msk [vmem:[#allocation3 + $0x2c] sm:$0xc] %vm647_vm13, %v819_v51  ;;  %v821_v11 = vrot.slane %v819_v51, 4 }
 0x22b   : > { %v702_v55 = vsel %vm640_vm15, %v700_v54, %v701_v52 }
 0x22c   : > { %v704_v57 = vsel %vm703_vm14, %v697_v49, %v702_v55  ;;  %v757_v58 = vpop.permute.xlu0 %756 }
 0x22d   : > { %v635_v59 = vpop.permute.xlu1 %634  ;;  %707 = vst [vmem:[#allocation3 + $0xc] sm:$0xcc] %v704_v57  ;;  %v760_v62 = vrot.slane %v757_v58, 4 }
 0x22e   : > { %v638_v0 = vrot.slane %v635_v59, 4 }
 0x22f   : > { %v762_v1 = vsel %vm640_vm15, %v760_v62, %v761_v61 }
 0x230   : > { %v641_v2 = vsel %vm640_vm15, %v638_v0, %v639_v60  ;;  %v764_v4 = vsel %vm763_vm3, %v757_v58, %v762_v1  ;;  %v817_v7 = vpop.permute.xlu0 %816 }
 0x231   : > { %v643_v5 = vsel %vm642_vm4, %v635_v59, %v641_v2  ;;  %v669_v9 = vpop.permute.xlu1 %668  ;;  %767 = vst [vmem:[#allocation3 + $0x18] sm:$0xcc] %v764_v4  ;;  %v820_v12 = vrot.slane %v817_v7, 4 }
 0x232   : > { %646 = vst [vmem:[#allocation3] sm:$0xcc] %v643_v5  ;;  %v671_v13 = vrot.slane %v669_v9, 4  ;;  %678 = vst.msk [vmem:[#allocation3 + $0x14] sm:$0x3] %vm615_vm12, %v669_v9 }
 0x233   : > { %v822_v14 = vsel %vm640_vm15, %v820_v12, %v821_v11 }
 0x234   : > { %v672_v15 = vsel %vm640_vm15, %v670_v10, %v671_v13  ;;  %v824_v16 = vsel %vm823_vm5, %v817_v7, %v822_v14  ;;  %v847_v27 = vpop.permute.xlu0 %846 }
 0x235   : > { %v674_v17 = vsel %vm673_vm6, %v667_v41, %v672_v15  ;;  %v729_v18 = vpop.permute.xlu1 %728  ;;  %827 = vst [vmem:[#allocation3 + $0x24] sm:$0xcc] %v824_v16  ;;  %v850_v33 = vrot.slane %v847_v27, 4 }
 0x236   : > { %677 = vst [vmem:[#allocation3 + $0xc] sm:$0x33] %v674_v17  ;;  %v731_v20 = vrot.slane %v729_v18, 4  ;;  %738 = vst.msk [vmem:[#allocation3 + $0x20] sm:$0x3] %vm615_vm12, %v729_v18 }
 0x238   : > { %v732_v21 = vsel %vm640_vm15, %v730_v19, %v731_v20 }
 0x239   : > { %v734_v22 = vsel %vm733_vm7, %v727_v43, %v732_v21  ;;  %v789_v23 = vpop.permute.xlu1 %788  ;;  %v1963_v24 = vld [vmem:[#allocation3 + $0x8] ss:$12 sps:$4 sm:$0xff]   ;;  %v859_v43 = vld [vmem:[%s2530_s4] sm:$0x3] }
 0x23a   : > { %737 = vst [vmem:[#allocation3 + $0x18] sm:$0x33] %v734_v22  ;;  %v791_v26 = vrot.slane %v789_v23, 4  ;;  %798 = vst.msk [vmem:[#allocation3 + $0x2c] sm:$0x3] %vm615_vm12, %v789_v23  ;;  %1865 = vmatpush3.bf16.msra.mxu1 %v1963_v24 }
 0x23b   : > { %1866 = vmatprep.subr.bf16.mxu1 %v2110_v3 }
 0x23c   : > { %v792_v28 = vsel %vm640_vm15, %v790_v25, %v791_v26 }
 0x23d   : > { %v794_v29 = vsel %vm793_vm8, %v787_v46, %v792_v28  ;;  %v849_v30 = vpop.permute.xlu1 %848  ;;  %v1964_v31 = vld [vmem:[#allocation3 + $0x4] ss:$12 sps:$4 sm:$0xff]   ;;  %v1966_v32 = vld [vmem:[#allocation3] ss:$12 sps:$4 sm:$0xff]  }
 0x23e   : > { %797 = vst [vmem:[#allocation3 + $0x24] sm:$0x33] %v794_v29  ;;  %v851_v34 = vrot.slane %v849_v30, 4  ;;  %858 = vst.msk [vmem:[#allocation3 + $0x38] sm:$0x3] %vm615_vm12, %v849_v30  ;;  %929 = vmatprep.subr.bf16.mxu0 %v1964_v31 }
 0x23f   : > { %930 = vmatpush1.bf16.msra.mxu0 %v1966_v32 }
 0x240   : > { %v852_v35 = vsel %vm640_vm15, %v850_v33, %v851_v34 }
 0x241   : > { %v854_v36 = vsel %vm853_vm9, %v847_v27, %v852_v35  ;;  %v1967_v37 = vld [vmem:[#allocation3 + $0x20] ss:$12 sps:$4 sm:$0xff]  }
 0x242   : > { %857 = vst [vmem:[#allocation3 + $0x30] sm:$0x33] %v854_v36  ;;  %1867 = vmatpush3.bf16.msra.mxu1 %v1967_v37 }
 0x243   : > { %1868 = vmatprep.subr.bf16.mxu1 %v2110_v3 }
 0x245   : > { %v1968_v38 = vld [vmem:[#allocation3 + $0x1c] ss:$12 sps:$4 sm:$0xff]   ;;  %v1970_v39 = vld [vmem:[#allocation3 + $0x18] ss:$12 sps:$4 sm:$0xff]   ;;  %v874_v49 = vpop.permute.xlu0 %873 }
 0x246   : > { %v1971_v40 = vld [vmem:[#allocation3 + $0x38] ss:$0 sps:$4 sm:$0x33]   ;;  %931 = vmatprep.subr.bf16.mxu0 %v1968_v38 }
 0x247   : > { %932 = vmatpush1.bf16.msra.mxu0 %v1970_v39  ;;  %v927_v41 = vsel %vm420_vm1, %v1971_v40, 0 }
 0x248   : > { %1869 = vmatpush3.bf16.msra.mxu1 %v927_v41 }
 0x249   : > { %v868_v42 = vld [vmem:[#allocation3 + $0x30] sm:$0x33]  ;;  %1874 = vmatprep.subr.bf16.mxu1 %v2110_v3 }
 0x24a   : > { %v1811_v44 = vcombine.high %v868_v42, %v868_v42  ;;  %v1810_v46 = vcombine.low %v868_v42, %v868_v42 }
 0x24b   : > { %1871 = vmatmul.mubr.msk.bf16.vlgmr.msra.gmra.mrb[4].mxu1 %vm916_vm2, %v859_v43 }
 0x24c   : > { %1813 = vmatprep.subr.msk.bf16.mxu0 %vm420_vm1, %v1811_v44  ;;  %v921_v48 = vsel %vm420_vm1, %v1810_v46, 0  ;;  %1880 = vmatprep.mubr.msk.bf16.mxu1 %vm2112_vm0, %v2110_v3 }
 0x24d   : > { %934 = vmatpush1.bf16.msra.mxu0 %v921_v48 }
 0x250   : > { %1814 = vmatmul.mubr.msk.bf16.vlgmr.msra.gmra.mrb[4].mxu0 %vm916_vm2, %v859_v43 }
 0x251   : > { %1413 = vmatprep.mubr.bf16.mxu0 %v2111_v6 }
 0x31e   : > { %v1004_v51 = vpop.f32.mrb[4].mxu1 }
 0x31f   : > { %v1005_v52 = vadd.f32 %v1004_v51, %v874_v49  ;;  %v1872_v54 = vpop.f32.mrb[5].mxu1 }
 0x320   : > { %v1007_v55 = vpop.f32.mrb[6].mxu1 }
 0x321   : > { %v1012_v57 = vsub.f32 0.0, %v1005_v52  ;;  %v1873_v58 = vpop.f32.mrb[7].mxu1 }
 0x323   : > { %v963_v59 = vpop.f32.mrb[4].mxu0  ;;  %v1017_v60 = vmul.f32 1.442695, %v1012_v57 }
 0x324   : > { %v964_v61 = vadd.f32 %v963_v59, %v874_v49  ;;  %v965_v62 = vpop.f32.mrb[5].mxu0 }
 0x325   : > { %v966_v0 = vadd.f32 %v965_v62, %v874_v49  ;;  %v967_v1 = vpop.f32.mrb[6].mxu0  ;;  %2007 = vpow2.f32 %v1017_v60 }
 0x326   : > { %v1010_v2 = vsub.f32 0.0, %v964_v61  ;;  %v968_v4 = vpop.f32.mrb[7].mxu0 }
 0x327   : > { %v1011_v5 = vsub.f32 0.0, %v966_v0 }
 0x328   : > { %v1013_v7 = vmul.f32 1.442695, %v1010_v2 }
 0x329   : > { %v1015_v9 = vmul.f32 1.442695, %v1011_v5 }
 0x32a   : > { %2009 = vpow2.f32 %v1013_v7 }
 0x32b   : > { %2011 = vpow2.f32 %v1015_v9  ;;  %v1323_v9 = vld [vmem:[%s2533_s7] sm:$0xf] }
 0x32f   : > { %v2008_v10 = vpop.eup %2007 }
 0x330   : > { %v1021_v11 = vadd.f32 1.0, %v2008_v10 }
 0x332   : > { %2013 = vrcp.f32 %v1021_v11 }
 0x334   : > { %v2010_v12 = vpop.eup %2009 }
 0x335   : > { %v2012_v13 = vpop.eup %2011  ;;  %v1019_v14 = vadd.f32 1.0, %v2010_v12 }
 0x336   : > { %v1020_v15 = vadd.f32 1.0, %v2012_v13 }
 0x337   : > { %2015 = vrcp.f32 %v1019_v14 }
 0x338   : > { %2017 = vrcp.f32 %v1020_v15 }
 0x33c   : > { %v2014_v16 = vpop.eup %2013 }
 0x33d   : > { %v1027_v17 = vmul.f32 %v2014_v16, %v1005_v52 }
 0x33f   : > { %v1030_v19 = vmul.f32 %v1027_v17, %v2274_v47 }
 0x341   : > { %v2016_v18 = vpop.eup %2015  ;;  %v1033_v24 = vpack.c.bf16 %v1030_v19, %v1030_v19 }
 0x342   : > { %v2018_v20 = vpop.eup %2017  ;;  %v1025_v21 = vmul.f32 %v2016_v18, %v964_v61 }
 0x343   : > { %v1026_v22 = vmul.f32 %v2018_v20, %v966_v0  ;;  %v1051_v28 = vrot.slane %v1033_v24, %v2245_v8 }
 0x344   : > { %v1028_v23 = vmul.f32 %v1025_v21, %v2272_v45 }
 0x345   : > { %v1029_v25 = vmul.f32 %v1026_v22, %v2276_v50 }
 0x347   : > { %v1816_v26 = vpack.c.bf16 %v1029_v25, %v1028_v23 }
 0x349   : > { %v1044_v27 = vrot.slane %v1816_v26, %v2245_v8 }
 0x34b   : > { %v1052_v29 = vcombine.low %v1044_v27, %v1051_v28 }
 0x34d   : > { %1053 = vrot.lane.b32.xlu1 %v1052_v29, %s2113_s30  ;;  %s2547_s30 = smov 108  }
 0x3bf   : > { %v1054_v30 = vpop.permute.xlu1 %1053 }
 0x3c0   : > { %v1055_v31 = vrot.slane %v1054_v30, 6 }
 0x3c2   : > { %v1056_v47 = vsel %vm586_vm10, %v1055_v31, %v1054_v30 }
 0x3c3   : > { %1058 = vst.msk [vmem:[#allocation2] sm:$0x3f] %vm2288_vm11, %v1056_v47 }
 0x3ca   : > { %v1109_v32 = vld [vmem:[#allocation2] sm:$0x3f] }
 0x3cb   : > { %v1080_v45 = vld [vmem:[#allocation2] sm:$0x3f]  ;;  %v1118_v33 = vrot.slane %v1109_v32, %v2245_v8  ;;  %v1111_v51 = vcombine.high %v1109_v32, %v1109_v32 }
 0x3cc   : > { %v1096_v50 = vrot.slane %v1080_v45, %v2245_v8  ;;  %v1167_v34 = vld [vmem:[#allocation2] sm:$0x3f]  ;;  %v1082_v44 = vcombine.low %v1080_v45, %v1080_v45 }
 0x3cd   : > { %v1138_v35 = vld [vmem:[#allocation2] sm:$0x3f]  ;;  %1126 = vrot.lane.b32.xlu0 %v1118_v33, %s2114_s12  ;;  %v1176_v37 = vrot.slane %v1167_v34, %v2245_v8  ;;  %v1125_v54 = vrot.slane %v1111_v51, %v2245_v8  ;;  %v1169_v57 = vcombine.high %v1167_v34, %v1167_v34 }
 0x3ce   : > { %v1059_v36 = vld [vmem:[#allocation2] sm:$0x3f]  ;;  %1099 = vrot.lane.b32.xlu1 %v1096_v50, %s2115_s13  ;;  %v1154_v38 = vrot.slane %v1138_v35, %v2245_v8  ;;  %v1089_v49 = vrot.slane %v1082_v44, %v2245_v8  ;;  %v1140_v52 = vcombine.low %v1138_v35, %v1138_v35 }
 0x3cf   : > { %1817 = vst.sshfl [vmem:[#allocation3] sm:$0xf pattern:$0x76325410] %v1059_v36  ;;  %v1225_v63 = vld [vmem:[#allocation2] sm:$0x3f]  ;;  %v1061_v40 = vcombine.high %v1059_v36, %v1059_v36  ;;  %v1183_v59 = vrot.slane %v1169_v57, %v2245_v8 }
 0x3d0   : > { %v1196_v39 = vld [vmem:[#allocation2] sm:$0x3f]  ;;  %v1234_v42 = vrot.slane %v1225_v63, %v2245_v8  ;;  %v1147_v55 = vrot.slane %v1140_v52, %v2245_v8  ;;  %v1227_v61 = vcombine.high %v1225_v63, %v1225_v63 }
 0x3d1   : > { %1184 = vrot.lane.b32.xlu0 %v1176_v37, %s2116_s14  ;;  %v1075_v41 = vrot.slane %v1061_v40, %v2245_v8  ;;  %v1212_v43 = vrot.slane %v1196_v39, %v2245_v8  ;;  %v1254_v46 = vld [vmem:[#allocation2] sm:$0x3f]  ;;  %v1198_v58 = vcombine.low %v1196_v39, %v1196_v39 }
 0x3d2   : > { %1157 = vrot.lane.b32.xlu1 %v1154_v38, %s2117_s15  ;;  %v1270_v48 = vrot.slane %v1254_v46, %v2245_v8  ;;  %v1256_v62 = vcombine.low %v1254_v46, %v1254_v46  ;;  %v1283_v0 = vld [vmem:[#allocation2] sm:$0x3f]  ;;  %v1241_v1 = vrot.slane %v1227_v61, %v2245_v8 }
 0x3d3   : > { %1079 = vst.msk [vmem:[#allocation3 + $0x8] sm:$0x3] %vm615_vm12, %v1075_v41  ;;  %v1205_v60 = vrot.slane %v1198_v58, %v2245_v8  ;;  %v1285_v4 = vcombine.high %v1283_v0, %v1283_v0  ;;  %v1292_v7 = vrot.slane %v1283_v0, %v2245_v8 }
 0x3d4   : > { %v1263_v2 = vrot.slane %v1256_v62, %v2245_v8 }
 0x3d5   : > { %1242 = vrot.lane.b32.xlu0 %v1234_v42, %s2118_s16  ;;  %v1299_v5 = vrot.slane %v1285_v4, %v2245_v8 }
 0x3d6   : > { %1215 = vrot.lane.b32.xlu1 %v1212_v43, %s2547_s30 }
 0x3d9   : > { %1097 = vrot.lane.b32.xlu0 %v1089_v49, %s2115_s13 }
 0x3da   : > { %1273 = vrot.lane.b32.xlu1 %v1270_v48, %s2120_s24 }
 0x3dd   : > { %1155 = vrot.lane.b32.xlu0 %v1147_v55, %s2117_s15  ;;  %s1898_s15 = smul.u32 384, %s2204_s21  ;;  %s2122_s21 = smov [#allocation5]  }
 0x3de   : > { %1128 = vrot.lane.b32.xlu1 %v1125_v54, %s2114_s12  ;;  %s377_s12 = sand.u32 1, %s2099_s18  }
 0x3df   : > { %s1896_s13 = smul.u32 24, %s377_s12  ;;  %s2484_s22 = scalar_lea.hbm %s2537_s11, %s1898_s15 }
 0x3e0   : > { %s1718_s29 = scalar_lea.sflag [#allocation6], %s377_s12 }
 0x3e1   : > { %1213 = vrot.lane.b32.xlu0 %v1205_v60, %s2547_s30 }
 0x3e2   : > { %1186 = vrot.lane.b32.xlu1 %v1183_v59, %s2116_s14  ;;  %s379_s14 = scalar_lea.vmem [#allocation5], %s1896_s13  ;;  %s2049_s13 = sshll.u32 %s2122_s21, 4  ;;  %s2050_s13 = int_to_ptr.vmem [resolvable:$false] %s2049_s13 }
 0x3e3   : > { %s2051_s0 = scalar_lea.vmem %s2050_s13, 768 }
 0x3e5   : > { %1271 = vrot.lane.b32.xlu0 %v1263_v2, %s2120_s24 }
 0x3e6   : > { %1244 = vrot.lane.b32.xlu1 %v1241_v1, %s2118_s16  ;;  %s1732_s16 = sshll.u32 %s379_s14, 4  ;;  %s2486_s16 = int_to_ptr.vmem [resolvable:$true] %s1732_s16 }
 0x3e7   : > { %s2045_s30 = scalar_lea.vmem %s2486_s16, 384  ;;  %p2052_p0 = scmp.lt.s32.totalorder %s2486_s16, %s2050_s13 }
 0x3e8   : > { %p2046_p11 = scmp.ne.s32.totalorder %s2486_s16, %s2045_s30  ;;  %p2053_p1 = scmp.lt.s32.totalorder %s2051_s0, %s2045_s30 }
 0x3e9   : > { %1300 = vrot.lane.b32.xlu0 %v1292_v7, %s2121_s25 }
 0x3ea   : > { %1302 = vrot.lane.b32.xlu1 %v1299_v5, %s2121_s25  ;;  %v1312_v5 = vld [vmem:[%s2532_s6] sm:$0x3]  ;;  %p2047_p12 = pnand %p2046_p11, %p2221_p5  ;;  %p2054_p2 = por %p2053_p1, %p2052_p0 }
 0x3ec   : > { %p2048_p13 = pneg %p2047_p12 }
 0x3ed   : > { %1326 = vperm.xlu0 %1951, %v1323_v9  }
 0x3ee   : > { %p2055_p3 = pnand %p2054_p2, %p2048_p13 }
 0x43f   : > { %v1127_v10 = vpop.permute.xlu0 %1126 }
 0x440   : > { %v1100_v11 = vpop.permute.xlu1 %1099  ;;  %v1130_v23 = vrot.slane %v1127_v10, 4 }
 0x441   : > { %1108 = vst.msk [vmem:[#allocation3 + $0x8] sm:$0xc] %vm647_vm13, %v1100_v11  ;;  %v1102_v17 = vrot.slane %v1100_v11, 4  ;;  %v1683_v11 = vld [vmem:[%s2536_s10] sm:$0xff] }
 0x442   : > { %1686 = vperm.xlu1 %1952, %v1683_v11  }
 0x443   : > { %v1185_v12 = vpop.permute.xlu0 %1184 }
 0x444   : > { %v1158_v13 = vpop.permute.xlu1 %1157  ;;  %v1188_v32 = vrot.slane %v1185_v12, 4 }
 0x445   : > { %1166 = vst.msk [vmem:[#allocation3 + $0x14] sm:$0xc] %vm647_vm13, %v1158_v13  ;;  %v1160_v24 = vrot.slane %v1158_v13, 4 }
 0x447   : > { %v1243_v14 = vpop.permute.xlu0 %1242 }
 0x448   : > { %v1216_v15 = vpop.permute.xlu1 %1215  ;;  %v1246_v40 = vrot.slane %v1243_v14, 4 }
 0x449   : > { %1224 = vst.msk [vmem:[#allocation3 + $0x20] sm:$0xc] %vm647_vm13, %v1216_v15  ;;  %v1218_v45 = vrot.slane %v1216_v15, 4 }
 0x44b   : > { %v1098_v16 = vpop.permute.xlu0 %1097 }
 0x44c   : > { %v1274_v8 = vpop.permute.xlu1 %1273  ;;  %v1101_v18 = vrot.slane %v1098_v16, 4 }
 0x44d   : > { %1282 = vst.msk [vmem:[#allocation3 + $0x2c] sm:$0xc] %vm647_vm13, %v1274_v8  ;;  %v1276_v41 = vrot.slane %v1274_v8, 4 }
 0x44e   : > { %v1103_v19 = vsel %vm640_vm15, %v1101_v18, %v1102_v17 }
 0x44f   : > { %v1104_v20 = vsel %vm642_vm4, %v1098_v16, %v1103_v19  ;;  %v1156_v22 = vpop.permute.xlu0 %1155 }
 0x450   : > { %v1129_v21 = vpop.permute.xlu1 %1128  ;;  %1107 = vst [vmem:[#allocation3] sm:$0xcc] %v1104_v20  ;;  %v1159_v26 = vrot.slane %v1156_v22, 4 }
 0x451   : > { %v1131_v25 = vrot.slane %v1129_v21, 4  ;;  %1137 = vst.msk [vmem:[#allocation3 + $0x14] sm:$0x3] %vm615_vm12, %v1129_v21 }
 0x452   : > { %v1161_v28 = vsel %vm640_vm15, %v1159_v26, %v1160_v24 }
 0x453   : > { %v1132_v27 = vsel %vm640_vm15, %v1130_v23, %v1131_v25  ;;  %v1162_v30 = vsel %vm703_vm14, %v1156_v22, %v1161_v28  ;;  %v1214_v47 = vpop.permute.xlu0 %1213 }
 0x454   : > { %v1133_v29 = vsel %vm673_vm6, %v1127_v10, %v1132_v27  ;;  %v1187_v31 = vpop.permute.xlu1 %1186  ;;  %1165 = vst [vmem:[#allocation3 + $0xc] sm:$0xcc] %v1162_v30  ;;  %v1217_v50 = vrot.slane %v1214_v47, 4 }
 0x455   : > { %1136 = vst [vmem:[#allocation3 + $0xc] sm:$0x33] %v1133_v29  ;;  %v1189_v33 = vrot.slane %v1187_v31, 4  ;;  %1195 = vst.msk [vmem:[#allocation3 + $0x20] sm:$0x3] %vm615_vm12, %v1187_v31 }
 0x456   : > { %v1219_v35 = vsel %vm640_vm15, %v1217_v50, %v1218_v45 }
 0x457   : > { %v1190_v34 = vsel %vm640_vm15, %v1188_v32, %v1189_v33  ;;  %v1220_v37 = vsel %vm763_vm3, %v1214_v47, %v1219_v35  ;;  %v1272_v63 = vpop.permute.xlu0 %1271 }
 0x458   : > { %v1191_v36 = vsel %vm733_vm7, %v1185_v12, %v1190_v34  ;;  %v1245_v38 = vpop.permute.xlu1 %1244  ;;  %v1983_v39 = vld [vmem:[#allocation3 + $0x8] ss:$12 sps:$4 sm:$0xff]   ;;  %1223 = vst [vmem:[#allocation3 + $0x18] sm:$0xcc] %v1220_v37  ;;  %v1275_v43 = vrot.slane %v1272_v63, 4 }
 0x459   : > { %1194 = vst [vmem:[#allocation3 + $0x18] sm:$0x33] %v1191_v36  ;;  %v1247_v42 = vrot.slane %v1245_v38, 4  ;;  %1253 = vst.msk [vmem:[#allocation3 + $0x2c] sm:$0x3] %vm615_vm12, %v1245_v38  ;;  %1875 = vmatpush3.bf16.msra.mxu1 %v1983_v39 }
 0x45a   : > { %v1277_v46 = vsel %vm640_vm15, %v1275_v43, %v1276_v41  ;;  %1876 = vmatprep.subr.bf16.mxu1 %v2110_v3 }
 0x45b   : > { %v1248_v44 = vsel %vm640_vm15, %v1246_v40, %v1247_v42  ;;  %v1278_v49 = vsel %vm823_vm5, %v1272_v63, %v1277_v46  ;;  %v1301_v52 = vpop.permute.xlu0 %1300  ;;  %v1994_v63 = vld [vmem:[#allocation4 + $0x8] ss:$0 sps:$4 sm:$0xff]   ;;  %v1483_v40 = vld [vmem:[%s2535_s9] sm:$0xf]  ;;  %v2043_v46 = vpack.c.bf16 %v2283_v56, %v2283_v56 }
 0x45c   : > { %v1249_v48 = vsel %vm793_vm8, %v1243_v14, %v1248_v44  ;;  %v1303_v51 = vpop.permute.xlu1 %1302  ;;  %v1984_v54 = vld [vmem:[#allocation3] ss:$12 sps:$4 sm:$0xff]   ;;  %v1986_v55 = vld [vmem:[#allocation3 + $0x4] ss:$12 sps:$4 sm:$0xff]   ;;  %1281 = vst [vmem:[#allocation3 + $0x24] sm:$0xcc] %v1278_v49 }
 0x45d   : > { %1252 = vst [vmem:[#allocation3 + $0x24] sm:$0x33] %v1249_v48  ;;  %v1305_v57 = vrot.slane %v1303_v51, 4  ;;  %1311 = vst.msk [vmem:[#allocation3 + $0x38] sm:$0x3] %vm615_vm12, %v1303_v51  ;;  %v1304_v58 = vrot.slane %v1301_v52, 4  ;;  %1381 = vmatprep.subr.bf16.mxu0 %v1986_v55  ;;  %v2044_v48 = vpack.c.bf16 %v2279_v53, %v2279_v53 }
 0x45e   : > { %1382 = vmatpush1.bf16.msra.mxu0 %v1984_v54  ;;  %v1600_v43 = vsel %vm640_vm15, %v1994_v63, 0  ;;  %v1480_v51 = vld [vmem:[%s2534_s8] sm:$0xf] }
 0x45f   : > { %v1306_v59 = vsel %vm640_vm15, %v1304_v58, %v1305_v57  ;;  %v1594_v49 = vsel %vm640_vm15, %v2044_v48, 0 }
 0x460   : > { %v1307_v60 = vsel %vm853_vm9, %v1301_v52, %v1306_v59  ;;  %v1987_v61 = vld [vmem:[#allocation3 + $0x20] ss:$12 sps:$4 sm:$0xff]  }
 0x461   : > { %1310 = vst [vmem:[#allocation3 + $0x30] sm:$0x33] %v1307_v60  ;;  %1877 = vmatpush3.bf16.msra.mxu1 %v1987_v61 }
 0x462   : > { %1878 = vmatprep.subr.bf16.mxu1 %v2110_v3 }
 0x464   : > { %v1988_v62 = vld [vmem:[#allocation3 + $0x18] ss:$12 sps:$4 sm:$0xff]   ;;  %v1990_v0 = vld [vmem:[#allocation3 + $0x1c] ss:$12 sps:$4 sm:$0xff]  }
 0x465   : > { %v1991_v1 = vld [vmem:[#allocation3 + $0x38] ss:$0 sps:$4 sm:$0x33]   ;;  %1383 = vmatprep.subr.bf16.mxu0 %v1990_v0 }
 0x466   : > { %1384 = vmatpush1.bf16.msra.mxu0 %v1988_v62  ;;  %v1379_v2 = vsel %vm420_vm1, %v1991_v1, 0 }
 0x467   : > { %1879 = vmatpush3.bf16.msra.mxu1 %v1379_v2 }
 0x468   : > { %v1321_v4 = vld [vmem:[#allocation3 + $0x30] sm:$0x33]  ;;  %1884 = vmatprep.subr.bf16.mxu1 %v2110_v3 }
 0x469   : > { %v1825_v7 = vcombine.high %v1321_v4, %v1321_v4  ;;  %v1824_v9 = vcombine.low %v1321_v4, %v1321_v4 }
 0x46a   : > { %1881 = vmatmul.mubr.msk.bf16.vlgmr.msra.gmra.mrb[8].mxu1 %vm916_vm2, %v1312_v5 }
 0x46b   : > { %1827 = vmatprep.subr.msk.bf16.mxu0 %vm420_vm1, %v1825_v7  ;;  %v1373_v10 = vsel %vm420_vm1, %v1824_v9, 0  ;;  %1886 = vmatprep.mubr.msk.bf16.mxu1 %vm2112_vm0, %v2110_v3 }
 0x46c   : > { %1386 = vmatpush1.bf16.msra.mxu0 %v1373_v10  ;;  %v1327_v12 = vpop.permute.xlu0 %1326 }
 0x46f   : > { %1828 = vmatmul.mubr.msk.bf16.vlgmr.msra.gmra.mrb[8].mxu0 %vm916_vm2, %v1312_v5  ;;  %vm2548_vm2 = vcmask 31744  }
 0x470   : > { %1531 = vmatprep.mubr.bf16.mxu0 %v2111_v6  ;;  %vm2549_vm10 = vmmov %vm2548_vm2 }
 0x4c1   : > { %v1687_v58 = vpop.permute.xlu1 %1686 }
 0x53d   : > { %v1456_v13 = vpop.f32.mrb[8].mxu1 }
 0x53e   : > { %v1457_v14 = vadd.f32 %v1456_v13, %v1327_v12  ;;  %v1882_v15 = vpop.f32.mrb[9].mxu1 }
 0x53f   : > { %v1459_v8 = vpop.f32.mrb[10].mxu1 }
 0x540   : > { %v1464_v16 = vsub.f32 0.0, %v1457_v14  ;;  %v1883_v17 = vpop.f32.mrb[11].mxu1 }
 0x542   : > { %v1415_v18 = vpop.f32.mrb[8].mxu0  ;;  %v1469_v19 = vmul.f32 1.442695, %v1464_v16 }
 0x543   : > { %v1416_v20 = vadd.f32 %v1415_v18, %v1327_v12  ;;  %v1417_v21 = vpop.f32.mrb[9].mxu0 }
 0x544   : > { %v1418_v22 = vadd.f32 %v1417_v21, %v1327_v12  ;;  %v1419_v23 = vpop.f32.mrb[10].mxu0  ;;  %2019 = vpow2.f32 %v1469_v19 }
 0x545   : > { %v1462_v24 = vsub.f32 0.0, %v1416_v20  ;;  %v1420_v25 = vpop.f32.mrb[11].mxu0 }
 0x546   : > { %v1463_v26 = vsub.f32 0.0, %v1418_v22 }
 0x547   : > { %v1465_v27 = vmul.f32 1.442695, %v1462_v24 }
 0x548   : > { %v1467_v28 = vmul.f32 1.442695, %v1463_v26 }
 0x549   : > { %2021 = vpow2.f32 %v1465_v27 }
 0x54a   : > { %2023 = vpow2.f32 %v1467_v28 }
 0x54e   : > { %v2020_v29 = vpop.eup %2019 }
 0x54f   : > { %v1473_v30 = vadd.f32 1.0, %v2020_v29 }
 0x551   : > { %2025 = vrcp.f32 %v1473_v30 }
 0x553   : > { %v2022_v31 = vpop.eup %2021 }
 0x554   : > { %v2024_v47 = vpop.eup %2023  ;;  %v1471_v32 = vadd.f32 1.0, %v2022_v31 }
 0x555   : > { %v1472_v45 = vadd.f32 1.0, %v2024_v47 }
 0x556   : > { %2027 = vrcp.f32 %v1471_v32 }
 0x557   : > { %2029 = vrcp.f32 %v1472_v45 }
 0x55b   : > { %v2026_v33 = vpop.eup %2025 }
 0x55c   : > { %v1479_v50 = vmul.f32 %v2026_v33, %v1457_v14 }
 0x55e   : > { %v1486_v34 = vpack.c.bf16 %v1479_v50, %v1479_v50 }
 0x560   : > { %v2028_v35 = vpop.eup %2027  ;;  %v1497_v38 = vsel %vm420_vm1, %v1486_v34, 0 }
 0x561   : > { %v2030_v36 = vpop.eup %2029  ;;  %v1477_v37 = vmul.f32 %v2028_v35, %v1416_v20  ;;  %1885 = vmatpush3.bf16.msra.mxu1 %v1497_v38 }
 0x562   : > { %v1478_v39 = vmul.f32 %v2030_v36, %v1418_v22  ;;  %1890 = vmatprep.subr.bf16.mxu1 %v2110_v3 }
 0x563   : > { %v1484_v41 = vpack.c.bf16 %v1477_v37, %v1477_v37 }
 0x564   : > { %v1485_v42 = vpack.c.bf16 %v1478_v39, %v1478_v39  ;;  %1887 = vmatmul.mubr.msk.bf16.vlgmr.msra.gmra.mrb[12].mxu1 %vm2548_vm2, %v1483_v40 }
 0x565   : > { %v1491_v44 = vsel %vm420_vm1, %v1484_v41, 0  ;;  %1891 = vmatpush3.bf16.msra.mxu1 %v1600_v43  ;;  %1892 = vmatprep.mubr.msk.bf16.mxu1 %vm2112_vm0, %v2110_v3  ;;  %vm1715_vm0 = vcmask 556032  }
 0x566   : > { %1830 = vmatprep.subr.msk.bf16.mxu0 %vm420_vm1, %v1485_v42  ;;  %vm1588_vm1 = vcmask 64512  }
 0x567   : > { %1500 = vmatpush1.bf16.msra.mxu0 %v1491_v44 }
 0x568   : > { %1836 = vmatprep.subr.msk.bf16.mxu0 %vm640_vm15, %v2043_v46 }
 0x56a   : > { %1831 = vmatmul.mubr.msk.bf16.vlgmr.msra.gmra.mrb[12].mxu0 %vm2549_vm10, %v1483_v40 }
 0x56b   : > { %1603 = vmatpush1.bf16.msra.mxu0 %v1594_v49  ;;  %1634 = vmatprep.mubr.bf16.mxu0 %v2111_v6 }
 0x56c   : > { %1893 = vmatmul.mubr.msk.bf16.vlgmr.msra.gmra.mrb[16].mxu1 %vm1588_vm1, %v1480_v51 }
 0x572   : > { %1837 = vmatmul.mubr.msk.bf16.vlgmr.msra.gmra.mrb[16].mxu0 %vm1588_vm1, %v1480_v51 }
 0x637   : > { %v1574_v53 = vpop.f32.mrb[12].mxu1 }
 0x638   : > { %v1888_v56 = vpop.f32.mrb[13].mxu1 }
 0x639   : > { %v1577_v52 = vpop.f32.mrb[14].mxu1 }
 0x63a   : > { %v1889_v3 = vpop.f32.mrb[15].mxu1 }
 0x63d   : > { %v1533_v54 = vpop.f32.mrb[12].mxu0 }
 0x63e   : > { %v1535_v55 = vpop.f32.mrb[13].mxu0 }
 0x63f   : > { %v1537_v57 = vpop.f32.mrb[14].mxu0  ;;  %v1677_v59 = vpop.f32.mrb[16].mxu1 }
 0x640   : > { %v1538_v60 = vpop.f32.mrb[15].mxu0  ;;  %v1678_v61 = vadd.f32 %v1677_v59, %v1574_v53  ;;  %v1894_v62 = vpop.f32.mrb[17].mxu1 }
 0x641   : > { %v1680_v0 = vpop.f32.mrb[18].mxu1 }
 0x642   : > { %v1691_v1 = vadd.f32 %v1687_v58, %v1678_v61  ;;  %v1895_v2 = vpop.f32.mrb[19].mxu1 }
 0x644   : > { %v1694_v4 = vsub.f32 0.0, %v1691_v1 }
 0x645   : > { %v1636_v5 = vpop.f32.mrb[16].mxu0 }
 0x646   : > { %v1637_v6 = vadd.f32 %v1636_v5, %v1533_v54  ;;  %v1638_v7 = vpop.f32.mrb[17].mxu0  ;;  %v1699_v9 = vmul.f32 1.442695, %v1694_v4 }
 0x647   : > { %v1639_v10 = vadd.f32 %v1638_v7, %v1535_v55  ;;  %v1640_v11 = vpop.f32.mrb[18].mxu0 }
 0x648   : > { %v1689_v12 = vadd.f32 %v1687_v58, %v1637_v6  ;;  %v1641_v13 = vpop.f32.mrb[19].mxu0  ;;  %2031 = vpow2.f32 %v1699_v9 }
 0x649   : > { %v1690_v14 = vadd.f32 %v1687_v58, %v1639_v10 }
 0x64a   : > { %v1692_v15 = vsub.f32 0.0, %v1689_v12 }
 0x64b   : > { %v1693_v8 = vsub.f32 0.0, %v1690_v14 }
 0x64c   : > { %v1695_v16 = vmul.f32 1.442695, %v1692_v15 }
 0x64d   : > { %v1697_v17 = vmul.f32 1.442695, %v1693_v8 }
 0x64e   : > { %2033 = vpow2.f32 %v1695_v16 }
 0x64f   : > { %2035 = vpow2.f32 %v1697_v17 }
 0x652   : > { %v2032_v18 = vpop.eup %2031 }
 0x653   : > { %v1703_v19 = vadd.f32 1.0, %v2032_v18 }
 0x655   : > { %2037 = vrcp.f32 %v1703_v19 }
 0x658   : > { %v2034_v20 = vpop.eup %2033 }
 0x659   : > { %v2036_v21 = vpop.eup %2035  ;;  %v1701_v22 = vadd.f32 1.0, %v2034_v20 }
 0x65a   : > { %v1702_v23 = vadd.f32 1.0, %v2036_v21 }
 0x65b   : > { %2039 = vrcp.f32 %v1701_v22 }
 0x65c   : > { %2041 = vrcp.f32 %v1702_v23 }
 0x65f   : > { %v2038_v24 = vpop.eup %2037 }
 0x660   : > { %v1712_v25 = vmul.f32 %v2038_v24, %v1691_v1 }
 0x662   : > { %1716 = vst.msk [vmem:[%s379_s14 + $0x10] sm:$0xff] %vm1715_vm0, %v1712_v25 }
 0x665   : > { %v2040_v26 = vpop.eup %2039 }
 0x666   : > { %v2042_v27 = vpop.eup %2041  ;;  %v1710_v28 = vmul.f32 %v2040_v26, %v1689_v12 }
 0x667   : > { %v1711_v29 = vmul.f32 %v2042_v27, %v1690_v14 }
 0x668   : > { %1713 = vst [vmem:[%s379_s14] sm:$0xff] %v1710_v28 }
 0x669   : > { %1714 = vst [vmem:[%s379_s14 + $0x8] sm:$0xff] %v1711_v29 }
 0x66a   : > { %2058 = shalt.err (!%p2055_p3)
}
 0x66b   : > { %s2059_s12 = scalar_lea.hbm %s2484_s22, 384  ;;  %s2063_s24 = scalar_lea.hbm %s2537_s11, 768 }
 0x66c   : > { %p2060_p4 = scmp.ne.s32.totalorder %s2484_s22, %s2059_s12  ;;  %p2064_p9 = scmp.lt.u32.totalorder %s2484_s22, %s2537_s11 }
 0x66d   : > { %p2065_p10 = scmp.lt.u32.totalorder %s2063_s24, %s2059_s12  ;;  %p2067_p12 = scmp.lt.u32.totalorder %s2059_s12, %s2484_s22 }
 0x66e   : > { %p2061_p7 = pnand %p2060_p4, %p2221_p5 }
 0x66f   : > { %p2066_p11 = por %p2065_p10, %p2064_p9 }
 0x670   : > { %p2062_p8 = pneg %p2061_p7 }
 0x671   : > { %p2068_p13 = por %p2067_p12, %p2066_p11 }
 0x673   : > { %p2069_p0 = pnand %p2068_p13, %p2062_p8 }
 0x675   : > { %2072 = shalt.err (!%p2069_p0)
}
 0x676   : > { %1899 = dma.vmem_to_hbm [thread:$0]  (%p2221_p5), %s2486_s16, 384, %s2484_s22, %s1718_s29  }
 0x677 PF: > { %p1905_p1 = scmp.ge.s32.totalorder %s2107_s20, 2  ;;  %s1744_s0 = sand.u32 1, %s2095_s17  }
 0x678   : > { %s1745_s30 = scalar_lea.sflag [#allocation6], %s1744_s0 }
 0x679   : > { %p1902_p2 = pnand %p1905_p1, %p2225_p6 }
 0x67b   : > { %2090 = dma.done.wait (!%p1902_p2), %s1745_s30, 384  }
 0x67c   : > { %2092 = vsyncadd (!%p1902_p2), %s1745_s30, 4294966912  ;;  %p21_p3 = scmp.ge.s32.totalorder %s2208_s23, 4   ;;  %s2550_s17 = smov %s2099_s18 }
 0x67d   : > { %s2551_s18 = smov %s2103_s19  ;;  %s2552_s19 = smov %s2219_s26 }
 0x67e   : > { %s2553_s20 = smov %s2208_s23  ;;  %23 = sbr.rel (!%p21_p3) target bundleno = 5 (0x5), region = 99 }
 0x685   :  { %1750 = vsyncpa [#allocation6], 1 }
 0x686   :  { %1752 = vsyncpa [#allocation6 + $0x1], 1 }

</bundles_post_ra>
